<compile_context>
chip_gen: v7x
topology: tpu7x:2x2x1
jax: 0.10.0
libtpu: 0.0.40
codegen_flags: <defaults>
</compile_context>

<pallas_src>
import jax
import jax.numpy as jnp
from jax import lax
from jax.experimental import pallas as pl
from jax.experimental.pallas import tpu as pltpu


# -----------------------------------------------------------------------------
# Fused kernel: stacked LSTM over time + final FC + sigmoid, all in VMEM/vregs.
# -----------------------------------------------------------------------------
def _make_fused_kernel(n_layers, seq_len):
    """Kernel for: x (T*B, D) -> n_layers stacked LSTM -> FC -> sigmoid."""

    def kernel(*refs):
        x_ref = refs[0]                                  # (T*B, D) time-major
        layer_refs = refs[1:1 + 3 * n_layers]            # (wihT, whhT, bias) per layer
        fcw_ref = refs[1 + 3 * n_layers]                 # (O, H)
        fcb_ref = refs[2 + 3 * n_layers]                 # (1, O)
        sig_ref = refs[3 + 3 * n_layers]                 # (B, O) output
        out_ref = refs[4 + 3 * n_layers]                 # (B, O) output
        hseq_ref = refs[5 + 3 * n_layers]                # scratch (T*B, H)

        T = seq_len
        B = out_ref.shape[0]
        H = layer_refs[1].shape[0]                       # whhT is (H, 4H)
        O = out_ref.shape[1]

        cur_in = x_ref[...]                              # (T*B, D_in) for layer 0
        h = None
        for l in range(n_layers):
            wihT = layer_refs[3 * l + 0][...]            # (D_in, 4H)
            whhT = layer_refs[3 * l + 1][...]            # (H,    4H)
            bias = layer_refs[3 * l + 2][...]            # (1,    4H)

            # Recurrence-independent input projection + bias for ALL T steps
            # as one batched MXU matmul (off the sequential critical path).
            xp = (jnp.dot(cur_in, wihT, preferred_element_type=jnp.float32)
                  + jnp.broadcast_to(bias, (T * B, 4 * H)))   # (T*B, 4H)

            h = jnp.zeros((B, H), jnp.float32)
            c = jnp.zeros((B, H), jnp.float32)
            # Static Python loop: T is small & fixed, every slice below is a
            # static sublane/lane slice; only h, c are loop-carried.
            for t in range(T):
                gates = (xp[t * B:(t + 1) * B, :]
                         + jnp.dot(h, whhT,
                                   preferred_element_type=jnp.float32))  # (B,4H)
                # One EUP sigmoid over the whole lane-dense (B,4H) vreg,
                # then slice i/f/o; only g needs a separate tanh.
                sig_all = jax.nn.sigmoid(gates)
                i = sig_all[:, 0 * H:1 * H]
                f = sig_all[:, 1 * H:2 * H]
                o = sig_all[:, 3 * H:4 * H]
                g = jnp.tanh(gates[:, 2 * H:3 * H])
                c = f * c + i * g
                h = o * jnp.tanh(c)
                if l < n_layers - 1:
                    hseq_ref[t * B:(t + 1) * B, :] = h   # feed next layer
            if l < n_layers - 1:
                cur_in = hseq_ref[...]                   # (T*B, H)

        h_last = h                                       # == lstm_out[:, -1, :]
        if O == 1:
            # O=1: lane reduction on the VPU/XLU instead of an N=1 MXU matmul.
            logits = (jnp.sum(h_last * fcw_ref[...], axis=-1, keepdims=True)
                      + fcb_ref[...])
        else:
            logits = (lax.dot_general(
                h_last, fcw_ref[...],
                dimension_numbers=(((1,), (1,)), ((), ())),
                preferred_element_type=jnp.float32) + fcb_ref[...])
        out_ref[...] = logits
        sig_ref[...] = jax.nn.sigmoid(logits)

    return kernel


# -----------------------------------------------------------------------------
# One-time parameter preparation (pre-transpose weights, combine biases).
# -----------------------------------------------------------------------------
def prepare_params(lstm_params, fc_w, fc_b):
    packed = []
    for (w_ih, w_hh, b_ih, b_hh) in lstm_params:
        packed.append((jnp.transpose(w_ih),              # (D_in, 4H)
                       jnp.transpose(w_hh),              # (H,    4H)
                       (b_ih + b_hh)[None, :]))          # (1,    4H)
    return packed, fc_w, fc_b[None, :]                   # fc_b -> (1, O)


# -----------------------------------------------------------------------------
# Full forward, mirroring SentimentLSTM.forward(x) -> (sig_out, out)
# -----------------------------------------------------------------------------
@jax.jit
def sentiment_lstm_forward(x, lstm_packed, fc_w, fc_b_row):
    """x: (batch, seq_len, seq_size). Returns (sig_out, out), each (batch, O)."""
    B, T, D = x.shape
    O = fc_w.shape[0]
    H = lstm_packed[0][1].shape[0]                       # whhT is (H, 4H)
    n_layers = len(lstm_packed)

    # Time-major, flattened: row t*B + b holds x[b, t, :] (lane/sublane dense).
    x2d = jnp.transpose(x, (1, 0, 2)).reshape(T * B, D)

    flat_params = []
    for wihT, whhT, bias in lstm_packed:
        flat_params += [wihT, whhT, bias]

    # No grid: a single kernel invocation with every operand as a full-array
    # VMEM block (all buffers total well under 100 KB at these shapes).
    sig_out, out = pl.pallas_call(
        _make_fused_kernel(n_layers, T),
        out_shape=(jax.ShapeDtypeStruct((B, O), jnp.float32),
                   jax.ShapeDtypeStruct((B, O), jnp.float32)),
        scratch_shapes=[pltpu.VMEM((T * B, H), jnp.float32)],
    )(x2d, *flat_params, fc_w, fc_b_row)
    return sig_out, out


# -----------------------------------------------------------------------------
# Pure-JAX reference (for a correctness check)
# -----------------------------------------------------------------------------
def ref_forward(x, lstm_params, fc_w, fc_b):
    B, T, _ = x.shape
    h_seq = x
    for (w_ih, w_hh, b_ih, b_hh) in lstm_params:
        H = w_hh.shape[1]
        h = jnp.zeros((B, H), jnp.float32)
        c = jnp.zeros((B, H), jnp.float32)
        outs = []
        for t in range(T):
            gates = h_seq[:, t, :] @ w_ih.T + h @ w_hh.T + b_ih + b_hh
            i, f, g, o = jnp.split(gates, 4, axis=1)
            i, f, o = jax.nn.sigmoid(i), jax.nn.sigmoid(f), jax.nn.sigmoid(o)
            g = jnp.tanh(g)
            c = f * c + i * g
            h = o * jnp.tanh(c)
            outs.append(h)
        h_seq = jnp.stack(outs, axis=1)
    out = h_seq[:, -1, :] @ fc_w.T + fc_b
    return jax.nn.sigmoid(out), out


if __name__ == "__main__":
    # Small shapes consistent with the module:
    #   seq_size (input feature dim) = 8, hidden_dim = 32, n_layers = 2,
    #   output_size = 1, batch = 2, seq_len = 8.
    B, T = 2, 8
    SEQ_SIZE, HIDDEN, N_LAYERS, OUTPUT = 8, 32, 2, 1

    key = jax.random.PRNGKey(0)
    k_x, key = jax.random.split(key)
    x = jax.random.normal(k_x, (B, T, SEQ_SIZE), jnp.float32)

    # Deterministic parameter init, PyTorch-style U(-1/sqrt(H), 1/sqrt(H)).
    bound = 1.0 / jnp.sqrt(jnp.float32(HIDDEN))
    lstm_params = []
    for layer in range(N_LAYERS):
        d_in = SEQ_SIZE if layer == 0 else HIDDEN
        k1, k2, k3, k4, key = jax.random.split(key, 5)
        w_ih = jax.random.uniform(k1, (4 * HIDDEN, d_in), jnp.float32, -bound, bound)
        w_hh = jax.random.uniform(k2, (4 * HIDDEN, HIDDEN), jnp.float32, -bound, bound)
        b_ih = jax.random.uniform(k3, (4 * HIDDEN,), jnp.float32, -bound, bound)
        b_hh = jax.random.uniform(k4, (4 * HIDDEN,), jnp.float32, -bound, bound)
        lstm_params.append((w_ih, w_hh, b_ih, b_hh))

    k5, k6, key = jax.random.split(key, 3)
    fc_w = jax.random.uniform(k5, (OUTPUT, HIDDEN), jnp.float32, -bound, bound)
    fc_b = jax.random.uniform(k6, (OUTPUT,), jnp.float32, -bound, bound)

    # One-time weight prep (pre-transposed gate weights, combined biases).
    lstm_packed, fc_w_p, fc_b_row = prepare_params(lstm_params, fc_w, fc_b)

    sig_out, out = sentiment_lstm_forward(x, lstm_packed, fc_w_p, fc_b_row)
    jax.block_until_ready((sig_out, out))

    ref_sig, ref_out = ref_forward(x, lstm_params, fc_w, fc_b)
    assert sig_out.shape == (B, OUTPUT) and out.shape == (B, OUTPUT)
    assert jnp.allclose(out, ref_out, atol=1e-5, rtol=1e-5)
    assert jnp.allclose(sig_out, ref_sig, atol=1e-5, rtol=1e-5)

    print("KERNEL_OK")
</pallas_src>

<mosaic_0001>
module attributes {stable_mosaic.version = 11 : i64} {
  func.func @kernel(%arg0: memref<16x8xf32, #tpu.memory_space<vmem>>, %arg1: memref<8x128xf32, #tpu.memory_space<vmem>>, %arg2: memref<32x128xf32, #tpu.memory_space<vmem>>, %arg3: memref<1x128xf32, #tpu.memory_space<vmem>>, %arg4: memref<32x128xf32, #tpu.memory_space<vmem>>, %arg5: memref<32x128xf32, #tpu.memory_space<vmem>>, %arg6: memref<1x128xf32, #tpu.memory_space<vmem>>, %arg7: memref<1x32xf32, #tpu.memory_space<vmem>>, %arg8: memref<1x1xf32, #tpu.memory_space<vmem>>, %arg9: memref<2x1xf32, #tpu.memory_space<vmem>>, %arg10: memref<2x1xf32, #tpu.memory_space<vmem>>, %arg11: memref<16x32xf32, #tpu.memory_space<vmem>>) attributes {dimension_semantics = [], scalar_prefetch = 0 : i64, scratch_operands = 1 : i64, tpu.core_type = #tpu.core_type<tc>} {
    %c0 = arith.constant 0 : index
    %c0_0 = arith.constant 0 : index
    %0 = vector.load %arg0[%c0, %c0_0] : memref<16x8xf32, #tpu.memory_space<vmem>>, vector<16x8xf32>
    %c0_1 = arith.constant 0 : index
    %c0_2 = arith.constant 0 : index
    %1 = vector.load %arg1[%c0_1, %c0_2] : memref<8x128xf32, #tpu.memory_space<vmem>>, vector<8x128xf32>
    %c0_3 = arith.constant 0 : index
    %c0_4 = arith.constant 0 : index
    %2 = vector.load %arg2[%c0_3, %c0_4] : memref<32x128xf32, #tpu.memory_space<vmem>>, vector<32x128xf32>
    %c0_5 = arith.constant 0 : index
    %c0_6 = arith.constant 0 : index
    %3 = vector.load %arg3[%c0_5, %c0_6] : memref<1x128xf32, #tpu.memory_space<vmem>>, vector<1x128xf32>
    %cst = arith.constant dense<0.000000e+00> : vector<16x128xf32>
    %4 = tpu.matmul %0, %1, %cst {dimension_numbers = #tpu.dot_dimension_numbers<[1], [0], [0], [1], [0, 0, 1, 1], [], []>} : vector<16x8xf32>, vector<8x128xf32>, vector<16x128xf32> -> vector<16x128xf32>
    %5 = vector.shape_cast %3 : vector<1x128xf32> to vector<1x128xf32>
    %6 = vector.broadcast %5 : vector<1x128xf32> to vector<16x128xf32>
    %7 = arith.addf %4, %6 : vector<16x128xf32>
    %cst_7 = arith.constant 0.000000e+00 : f32
    %8 = vector.broadcast %cst_7 : f32 to vector<2x32xf32>
    %cst_8 = arith.constant 0.000000e+00 : f32
    %9 = vector.broadcast %cst_8 : f32 to vector<2x32xf32>
    %10 = vector.extract_strided_slice %7 {offsets = [0, 0], sizes = [2, 128], strides = [1, 1]} : vector<16x128xf32> to vector<2x128xf32>
    %cst_9 = arith.constant dense<0.000000e+00> : vector<2x128xf32>
    %11 = tpu.matmul %8, %2, %cst_9 {dimension_numbers = #tpu.dot_dimension_numbers<[1], [0], [0], [1], [0, 0, 1, 1], [], []>} : vector<2x32xf32>, vector<32x128xf32>, vector<2x128xf32> -> vector<2x128xf32>
    %12 = arith.addf %10, %11 : vector<2x128xf32>
    %13 = arith.negf %12 : vector<2x128xf32>
    %14 = math.exp %13 : vector<2x128xf32>
    %cst_10 = arith.constant 1.000000e+00 : f32
    %15 = vector.broadcast %cst_10 : f32 to vector<2x128xf32>
    %16 = arith.addf %15, %14 : vector<2x128xf32>
    %17 = arith.divf %15, %16 : vector<2x128xf32>
    %18 = vector.extract_strided_slice %17 {offsets = [0, 0], sizes = [2, 32], strides = [1, 1]} : vector<2x128xf32> to vector<2x32xf32>
    %19 = vector.extract_strided_slice %17 {offsets = [0, 32], sizes = [2, 32], strides = [1, 1]} : vector<2x128xf32> to vector<2x32xf32>
    %20 = vector.extract_strided_slice %17 {offsets = [0, 96], sizes = [2, 32], strides = [1, 1]} : vector<2x128xf32> to vector<2x32xf32>
    %21 = vector.extract_strided_slice %12 {offsets = [0, 64], sizes = [2, 32], strides = [1, 1]} : vector<2x128xf32> to vector<2x32xf32>
    %22 = math.tanh %21 : vector<2x32xf32>
    %23 = arith.mulf %19, %9 : vector<2x32xf32>
    %24 = arith.mulf %18, %22 : vector<2x32xf32>
    %25 = arith.addf %23, %24 : vector<2x32xf32>
    %26 = math.tanh %25 : vector<2x32xf32>
    %27 = arith.mulf %20, %26 : vector<2x32xf32>
    %c0_11 = arith.constant 0 : index
    %c0_12 = arith.constant 0 : index
    %28 = vector.load %arg11[%c0_11, %c0_12] : memref<16x32xf32, #tpu.memory_space<vmem>>, vector<2x32xf32>
    tpu.vector_store %arg11[%c0_11, %c0_12], %27 {strides = array<i32>} : memref<16x32xf32, #tpu.memory_space<vmem>>, vector<2x32xf32>,
    %29 = vector.extract_strided_slice %7 {offsets = [2, 0], sizes = [2, 128], strides = [1, 1]} : vector<16x128xf32> to vector<2x128xf32>
    %cst_13 = arith.constant dense<0.000000e+00> : vector<2x128xf32>
    %30 = tpu.matmul %27, %2, %cst_13 {dimension_numbers = #tpu.dot_dimension_numbers<[1], [0], [0], [1], [0, 0, 1, 1], [], []>} : vector<2x32xf32>, vector<32x128xf32>, vector<2x128xf32> -> vector<2x128xf32>
    %31 = arith.addf %29, %30 : vector<2x128xf32>
    %32 = arith.negf %31 : vector<2x128xf32>
    %33 = math.exp %32 : vector<2x128xf32>
    %cst_14 = arith.constant 1.000000e+00 : f32
    %34 = vector.broadcast %cst_14 : f32 to vector<2x128xf32>
    %35 = arith.addf %34, %33 : vector<2x128xf32>
    %36 = arith.divf %34, %35 : vector<2x128xf32>
    %37 = vector.extract_strided_slice %36 {offsets = [0, 0], sizes = [2, 32], strides = [1, 1]} : vector<2x128xf32> to vector<2x32xf32>
    %38 = vector.extract_strided_slice %36 {offsets = [0, 32], sizes = [2, 32], strides = [1, 1]} : vector<2x128xf32> to vector<2x32xf32>
    %39 = vector.extract_strided_slice %36 {offsets = [0, 96], sizes = [2, 32], strides = [1, 1]} : vector<2x128xf32> to vector<2x32xf32>
    %40 = vector.extract_strided_slice %31 {offsets = [0, 64], sizes = [2, 32], strides = [1, 1]} : vector<2x128xf32> to vector<2x32xf32>
    %41 = math.tanh %40 : vector<2x32xf32>
    %42 = arith.mulf %38, %25 : vector<2x32xf32>
    %43 = arith.mulf %37, %41 : vector<2x32xf32>
    %44 = arith.addf %42, %43 : vector<2x32xf32>
    %45 = math.tanh %44 : vector<2x32xf32>
    %46 = arith.mulf %39, %45 : vector<2x32xf32>
    %c2 = arith.constant 2 : index
    %c0_15 = arith.constant 0 : index
    %47 = vector.load %arg11[%c2, %c0_15] : memref<16x32xf32, #tpu.memory_space<vmem>>, vector<2x32xf32>
    tpu.vector_store %arg11[%c2, %c0_15], %46 {strides = array<i32>} : memref<16x32xf32, #tpu.memory_space<vmem>>, vector<2x32xf32>,
    %48 = vector.extract_strided_slice %7 {offsets = [4, 0], sizes = [2, 128], strides = [1, 1]} : vector<16x128xf32> to vector<2x128xf32>
    %cst_16 = arith.constant dense<0.000000e+00> : vector<2x128xf32>
    %49 = tpu.matmul %46, %2, %cst_16 {dimension_numbers = #tpu.dot_dimension_numbers<[1], [0], [0], [1], [0, 0, 1, 1], [], []>} : vector<2x32xf32>, vector<32x128xf32>, vector<2x128xf32> -> vector<2x128xf32>
    %50 = arith.addf %48, %49 : vector<2x128xf32>
    %51 = arith.negf %50 : vector<2x128xf32>
    %52 = math.exp %51 : vector<2x128xf32>
    %cst_17 = arith.constant 1.000000e+00 : f32
    %53 = vector.broadcast %cst_17 : f32 to vector<2x128xf32>
    %54 = arith.addf %53, %52 : vector<2x128xf32>
    %55 = arith.divf %53, %54 : vector<2x128xf32>
    %56 = vector.extract_strided_slice %55 {offsets = [0, 0], sizes = [2, 32], strides = [1, 1]} : vector<2x128xf32> to vector<2x32xf32>
    %57 = vector.extract_strided_slice %55 {offsets = [0, 32], sizes = [2, 32], strides = [1, 1]} : vector<2x128xf32> to vector<2x32xf32>
    %58 = vector.extract_strided_slice %55 {offsets = [0, 96], sizes = [2, 32], strides = [1, 1]} : vector<2x128xf32> to vector<2x32xf32>
    %59 = vector.extract_strided_slice %50 {offsets = [0, 64], sizes = [2, 32], strides = [1, 1]} : vector<2x128xf32> to vector<2x32xf32>
    %60 = math.tanh %59 : vector<2x32xf32>
    %61 = arith.mulf %57, %44 : vector<2x32xf32>
    %62 = arith.mulf %56, %60 : vector<2x32xf32>
    %63 = arith.addf %61, %62 : vector<2x32xf32>
    %64 = math.tanh %63 : vector<2x32xf32>
    %65 = arith.mulf %58, %64 : vector<2x32xf32>
    %c4 = arith.constant 4 : index
    %c0_18 = arith.constant 0 : index
    %66 = vector.load %arg11[%c4, %c0_18] : memref<16x32xf32, #tpu.memory_space<vmem>>, vector<2x32xf32>
    tpu.vector_store %arg11[%c4, %c0_18], %65 {strides = array<i32>} : memref<16x32xf32, #tpu.memory_space<vmem>>, vector<2x32xf32>,
    %67 = vector.extract_strided_slice %7 {offsets = [6, 0], sizes = [2, 128], strides = [1, 1]} : vector<16x128xf32> to vector<2x128xf32>
    %cst_19 = arith.constant dense<0.000000e+00> : vector<2x128xf32>
    %68 = tpu.matmul %65, %2, %cst_19 {dimension_numbers = #tpu.dot_dimension_numbers<[1], [0], [0], [1], [0, 0, 1, 1], [], []>} : vector<2x32xf32>, vector<32x128xf32>, vector<2x128xf32> -> vector<2x128xf32>
    %69 = arith.addf %67, %68 : vector<2x128xf32>
    %70 = arith.negf %69 : vector<2x128xf32>
    %71 = math.exp %70 : vector<2x128xf32>
    %cst_20 = arith.constant 1.000000e+00 : f32
    %72 = vector.broadcast %cst_20 : f32 to vector<2x128xf32>
    %73 = arith.addf %72, %71 : vector<2x128xf32>
    %74 = arith.divf %72, %73 : vector<2x128xf32>
    %75 = vector.extract_strided_slice %74 {offsets = [0, 0], sizes = [2, 32], strides = [1, 1]} : vector<2x128xf32> to vector<2x32xf32>
    %76 = vector.extract_strided_slice %74 {offsets = [0, 32], sizes = [2, 32], strides = [1, 1]} : vector<2x128xf32> to vector<2x32xf32>
    %77 = vector.extract_strided_slice %74 {offsets = [0, 96], sizes = [2, 32], strides = [1, 1]} : vector<2x128xf32> to vector<2x32xf32>
    %78 = vector.extract_strided_slice %69 {offsets = [0, 64], sizes = [2, 32], strides = [1, 1]} : vector<2x128xf32> to vector<2x32xf32>
    %79 = math.tanh %78 : vector<2x32xf32>
    %80 = arith.mulf %76, %63 : vector<2x32xf32>
    %81 = arith.mulf %75, %79 : vector<2x32xf32>
    %82 = arith.addf %80, %81 : vector<2x32xf32>
    %83 = math.tanh %82 : vector<2x32xf32>
    %84 = arith.mulf %77, %83 : vector<2x32xf32>
    %c6 = arith.constant 6 : index
    %c0_21 = arith.constant 0 : index
    %85 = vector.load %arg11[%c6, %c0_21] : memref<16x32xf32, #tpu.memory_space<vmem>>, vector<2x32xf32>
    tpu.vector_store %arg11[%c6, %c0_21], %84 {strides = array<i32>} : memref<16x32xf32, #tpu.memory_space<vmem>>, vector<2x32xf32>,
    %86 = vector.extract_strided_slice %7 {offsets = [8, 0], sizes = [2, 128], strides = [1, 1]} : vector<16x128xf32> to vector<2x128xf32>
    %cst_22 = arith.constant dense<0.000000e+00> : vector<2x128xf32>
    %87 = tpu.matmul %84, %2, %cst_22 {dimension_numbers = #tpu.dot_dimension_numbers<[1], [0], [0], [1], [0, 0, 1, 1], [], []>} : vector<2x32xf32>, vector<32x128xf32>, vector<2x128xf32> -> vector<2x128xf32>
    %88 = arith.addf %86, %87 : vector<2x128xf32>
    %89 = arith.negf %88 : vector<2x128xf32>
    %90 = math.exp %89 : vector<2x128xf32>
    %cst_23 = arith.constant 1.000000e+00 : f32
    %91 = vector.broadcast %cst_23 : f32 to vector<2x128xf32>
    %92 = arith.addf %91, %90 : vector<2x128xf32>
    %93 = arith.divf %91, %92 : vector<2x128xf32>
    %94 = vector.extract_strided_slice %93 {offsets = [0, 0], sizes = [2, 32], strides = [1, 1]} : vector<2x128xf32> to vector<2x32xf32>
    %95 = vector.extract_strided_slice %93 {offsets = [0, 32], sizes = [2, 32], strides = [1, 1]} : vector<2x128xf32> to vector<2x32xf32>
    %96 = vector.extract_strided_slice %93 {offsets = [0, 96], sizes = [2, 32], strides = [1, 1]} : vector<2x128xf32> to vector<2x32xf32>
    %97 = vector.extract_strided_slice %88 {offsets = [0, 64], sizes = [2, 32], strides = [1, 1]} : vector<2x128xf32> to vector<2x32xf32>
    %98 = math.tanh %97 : vector<2x32xf32>
    %99 = arith.mulf %95, %82 : vector<2x32xf32>
    %100 = arith.mulf %94, %98 : vector<2x32xf32>
    %101 = arith.addf %99, %100 : vector<2x32xf32>
    %102 = math.tanh %101 : vector<2x32xf32>
    %103 = arith.mulf %96, %102 : vector<2x32xf32>
    %c8 = arith.constant 8 : index
    %c0_24 = arith.constant 0 : index
    %104 = vector.load %arg11[%c8, %c0_24] : memref<16x32xf32, #tpu.memory_space<vmem>>, vector<2x32xf32>
    tpu.vector_store %arg11[%c8, %c0_24], %103 {strides = array<i32>} : memref<16x32xf32, #tpu.memory_space<vmem>>, vector<2x32xf32>,
    %105 = vector.extract_strided_slice %7 {offsets = [10, 0], sizes = [2, 128], strides = [1, 1]} : vector<16x128xf32> to vector<2x128xf32>
    %cst_25 = arith.constant dense<0.000000e+00> : vector<2x128xf32>
    %106 = tpu.matmul %103, %2, %cst_25 {dimension_numbers = #tpu.dot_dimension_numbers<[1], [0], [0], [1], [0, 0, 1, 1], [], []>} : vector<2x32xf32>, vector<32x128xf32>, vector<2x128xf32> -> vector<2x128xf32>
    %107 = arith.addf %105, %106 : vector<2x128xf32>
    %108 = arith.negf %107 : vector<2x128xf32>
    %109 = math.exp %108 : vector<2x128xf32>
    %cst_26 = arith.constant 1.000000e+00 : f32
    %110 = vector.broadcast %cst_26 : f32 to vector<2x128xf32>
    %111 = arith.addf %110, %109 : vector<2x128xf32>
    %112 = arith.divf %110, %111 : vector<2x128xf32>
    %113 = vector.extract_strided_slice %112 {offsets = [0, 0], sizes = [2, 32], strides = [1, 1]} : vector<2x128xf32> to vector<2x32xf32>
    %114 = vector.extract_strided_slice %112 {offsets = [0, 32], sizes = [2, 32], strides = [1, 1]} : vector<2x128xf32> to vector<2x32xf32>
    %115 = vector.extract_strided_slice %112 {offsets = [0, 96], sizes = [2, 32], strides = [1, 1]} : vector<2x128xf32> to vector<2x32xf32>
    %116 = vector.extract_strided_slice %107 {offsets = [0, 64], sizes = [2, 32], strides = [1, 1]} : vector<2x128xf32> to vector<2x32xf32>
    %117 = math.tanh %116 : vector<2x32xf32>
    %118 = arith.mulf %114, %101 : vector<2x32xf32>
    %119 = arith.mulf %113, %117 : vector<2x32xf32>
    %120 = arith.addf %118, %119 : vector<2x32xf32>
    %121 = math.tanh %120 : vector<2x32xf32>
    %122 = arith.mulf %115, %121 : vector<2x32xf32>
    %c10 = arith.constant 10 : index
    %c0_27 = arith.constant 0 : index
    %123 = vector.load %arg11[%c10, %c0_27] : memref<16x32xf32, #tpu.memory_space<vmem>>, vector<2x32xf32>
    tpu.vector_store %arg11[%c10, %c0_27], %122 {strides = array<i32>} : memref<16x32xf32, #tpu.memory_space<vmem>>, vector<2x32xf32>,
    %124 = vector.extract_strided_slice %7 {offsets = [12, 0], sizes = [2, 128], strides = [1, 1]} : vector<16x128xf32> to vector<2x128xf32>
    %cst_28 = arith.constant dense<0.000000e+00> : vector<2x128xf32>
    %125 = tpu.matmul %122, %2, %cst_28 {dimension_numbers = #tpu.dot_dimension_numbers<[1], [0], [0], [1], [0, 0, 1, 1], [], []>} : vector<2x32xf32>, vector<32x128xf32>, vector<2x128xf32> -> vector<2x128xf32>
    %126 = arith.addf %124, %125 : vector<2x128xf32>
    %127 = arith.negf %126 : vector<2x128xf32>
    %128 = math.exp %127 : vector<2x128xf32>
    %cst_29 = arith.constant 1.000000e+00 : f32
    %129 = vector.broadcast %cst_29 : f32 to vector<2x128xf32>
    %130 = arith.addf %129, %128 : vector<2x128xf32>
    %131 = arith.divf %129, %130 : vector<2x128xf32>
    %132 = vector.extract_strided_slice %131 {offsets = [0, 0], sizes = [2, 32], strides = [1, 1]} : vector<2x128xf32> to vector<2x32xf32>
    %133 = vector.extract_strided_slice %131 {offsets = [0, 32], sizes = [2, 32], strides = [1, 1]} : vector<2x128xf32> to vector<2x32xf32>
    %134 = vector.extract_strided_slice %131 {offsets = [0, 96], sizes = [2, 32], strides = [1, 1]} : vector<2x128xf32> to vector<2x32xf32>
    %135 = vector.extract_strided_slice %126 {offsets = [0, 64], sizes = [2, 32], strides = [1, 1]} : vector<2x128xf32> to vector<2x32xf32>
    %136 = math.tanh %135 : vector<2x32xf32>
    %137 = arith.mulf %133, %120 : vector<2x32xf32>
    %138 = arith.mulf %132, %136 : vector<2x32xf32>
    %139 = arith.addf %137, %138 : vector<2x32xf32>
    %140 = math.tanh %139 : vector<2x32xf32>
    %141 = arith.mulf %134, %140 : vector<2x32xf32>
    %c12 = arith.constant 12 : index
    %c0_30 = arith.constant 0 : index
    %142 = vector.load %arg11[%c12, %c0_30] : memref<16x32xf32, #tpu.memory_space<vmem>>, vector<2x32xf32>
    tpu.vector_store %arg11[%c12, %c0_30], %141 {strides = array<i32>} : memref<16x32xf32, #tpu.memory_space<vmem>>, vector<2x32xf32>,
    %143 = vector.extract_strided_slice %7 {offsets = [14, 0], sizes = [2, 128], strides = [1, 1]} : vector<16x128xf32> to vector<2x128xf32>
    %cst_31 = arith.constant dense<0.000000e+00> : vector<2x128xf32>
    %144 = tpu.matmul %141, %2, %cst_31 {dimension_numbers = #tpu.dot_dimension_numbers<[1], [0], [0], [1], [0, 0, 1, 1], [], []>} : vector<2x32xf32>, vector<32x128xf32>, vector<2x128xf32> -> vector<2x128xf32>
    %145 = arith.addf %143, %144 : vector<2x128xf32>
    %146 = arith.negf %145 : vector<2x128xf32>
    %147 = math.exp %146 : vector<2x128xf32>
    %cst_32 = arith.constant 1.000000e+00 : f32
    %148 = vector.broadcast %cst_32 : f32 to vector<2x128xf32>
    %149 = arith.addf %148, %147 : vector<2x128xf32>
    %150 = arith.divf %148, %149 : vector<2x128xf32>
    %151 = vector.extract_strided_slice %150 {offsets = [0, 0], sizes = [2, 32], strides = [1, 1]} : vector<2x128xf32> to vector<2x32xf32>
    %152 = vector.extract_strided_slice %150 {offsets = [0, 32], sizes = [2, 32], strides = [1, 1]} : vector<2x128xf32> to vector<2x32xf32>
    %153 = vector.extract_strided_slice %150 {offsets = [0, 96], sizes = [2, 32], strides = [1, 1]} : vector<2x128xf32> to vector<2x32xf32>
    %154 = vector.extract_strided_slice %145 {offsets = [0, 64], sizes = [2, 32], strides = [1, 1]} : vector<2x128xf32> to vector<2x32xf32>
    %155 = math.tanh %154 : vector<2x32xf32>
    %156 = arith.mulf %152, %139 : vector<2x32xf32>
    %157 = arith.mulf %151, %155 : vector<2x32xf32>
    %158 = arith.addf %156, %157 : vector<2x32xf32>
    %159 = math.tanh %158 : vector<2x32xf32>
    %160 = arith.mulf %153, %159 : vector<2x32xf32>
    %c14 = arith.constant 14 : index
    %c0_33 = arith.constant 0 : index
    %161 = vector.load %arg11[%c14, %c0_33] : memref<16x32xf32, #tpu.memory_space<vmem>>, vector<2x32xf32>
    tpu.vector_store %arg11[%c14, %c0_33], %160 {strides = array<i32>} : memref<16x32xf32, #tpu.memory_space<vmem>>, vector<2x32xf32>,
    %c0_34 = arith.constant 0 : index
    %c0_35 = arith.constant 0 : index
    %162 = vector.load %arg11[%c0_34, %c0_35] : memref<16x32xf32, #tpu.memory_space<vmem>>, vector<16x32xf32>
    %c0_36 = arith.constant 0 : index
    %c0_37 = arith.constant 0 : index
    %163 = vector.load %arg4[%c0_36, %c0_37] : memref<32x128xf32, #tpu.memory_space<vmem>>, vector<32x128xf32>
    %c0_38 = arith.constant 0 : index
    %c0_39 = arith.constant 0 : index
    %164 = vector.load %arg5[%c0_38, %c0_39] : memref<32x128xf32, #tpu.memory_space<vmem>>, vector<32x128xf32>
    %c0_40 = arith.constant 0 : index
    %c0_41 = arith.constant 0 : index
    %165 = vector.load %arg6[%c0_40, %c0_41] : memref<1x128xf32, #tpu.memory_space<vmem>>, vector<1x128xf32>
    %cst_42 = arith.constant dense<0.000000e+00> : vector<16x128xf32>
    %166 = tpu.matmul %162, %163, %cst_42 {dimension_numbers = #tpu.dot_dimension_numbers<[1], [0], [0], [1], [0, 0, 1, 1], [], []>} : vector<16x32xf32>, vector<32x128xf32>, vector<16x128xf32> -> vector<16x128xf32>
    %167 = vector.shape_cast %165 : vector<1x128xf32> to vector<1x128xf32>
    %168 = vector.broadcast %167 : vector<1x128xf32> to vector<16x128xf32>
    %169 = arith.addf %166, %168 : vector<16x128xf32>
    %cst_43 = arith.constant 0.000000e+00 : f32
    %170 = vector.broadcast %cst_43 : f32 to vector<2x32xf32>
    %cst_44 = arith.constant 0.000000e+00 : f32
    %171 = vector.broadcast %cst_44 : f32 to vector<2x32xf32>
    %172 = vector.extract_strided_slice %169 {offsets = [0, 0], sizes = [2, 128], strides = [1, 1]} : vector<16x128xf32> to vector<2x128xf32>
    %cst_45 = arith.constant dense<0.000000e+00> : vector<2x128xf32>
    %173 = tpu.matmul %170, %164, %cst_45 {dimension_numbers = #tpu.dot_dimension_numbers<[1], [0], [0], [1], [0, 0, 1, 1], [], []>} : vector<2x32xf32>, vector<32x128xf32>, vector<2x128xf32> -> vector<2x128xf32>
    %174 = arith.addf %172, %173 : vector<2x128xf32>
    %175 = arith.negf %174 : vector<2x128xf32>
    %176 = math.exp %175 : vector<2x128xf32>
    %cst_46 = arith.constant 1.000000e+00 : f32
    %177 = vector.broadcast %cst_46 : f32 to vector<2x128xf32>
    %178 = arith.addf %177, %176 : vector<2x128xf32>
    %179 = arith.divf %177, %178 : vector<2x128xf32>
    %180 = vector.extract_strided_slice %179 {offsets = [0, 0], sizes = [2, 32], strides = [1, 1]} : vector<2x128xf32> to vector<2x32xf32>
    %181 = vector.extract_strided_slice %179 {offsets = [0, 32], sizes = [2, 32], strides = [1, 1]} : vector<2x128xf32> to vector<2x32xf32>
    %182 = vector.extract_strided_slice %179 {offsets = [0, 96], sizes = [2, 32], strides = [1, 1]} : vector<2x128xf32> to vector<2x32xf32>
    %183 = vector.extract_strided_slice %174 {offsets = [0, 64], sizes = [2, 32], strides = [1, 1]} : vector<2x128xf32> to vector<2x32xf32>
    %184 = math.tanh %183 : vector<2x32xf32>
    %185 = arith.mulf %181, %171 : vector<2x32xf32>
    %186 = arith.mulf %180, %184 : vector<2x32xf32>
    %187 = arith.addf %185, %186 : vector<2x32xf32>
    %188 = math.tanh %187 : vector<2x32xf32>
    %189 = arith.mulf %182, %188 : vector<2x32xf32>
    %190 = vector.extract_strided_slice %169 {offsets = [2, 0], sizes = [2, 128], strides = [1, 1]} : vector<16x128xf32> to vector<2x128xf32>
    %cst_47 = arith.constant dense<0.000000e+00> : vector<2x128xf32>
    %191 = tpu.matmul %189, %164, %cst_47 {dimension_numbers = #tpu.dot_dimension_numbers<[1], [0], [0], [1], [0, 0, 1, 1], [], []>} : vector<2x32xf32>, vector<32x128xf32>, vector<2x128xf32> -> vector<2x128xf32>
    %192 = arith.addf %190, %191 : vector<2x128xf32>
    %193 = arith.negf %192 : vector<2x128xf32>
    %194 = math.exp %193 : vector<2x128xf32>
    %cst_48 = arith.constant 1.000000e+00 : f32
    %195 = vector.broadcast %cst_48 : f32 to vector<2x128xf32>
    %196 = arith.addf %195, %194 : vector<2x128xf32>
    %197 = arith.divf %195, %196 : vector<2x128xf32>
    %198 = vector.extract_strided_slice %197 {offsets = [0, 0], sizes = [2, 32], strides = [1, 1]} : vector<2x128xf32> to vector<2x32xf32>
    %199 = vector.extract_strided_slice %197 {offsets = [0, 32], sizes = [2, 32], strides = [1, 1]} : vector<2x128xf32> to vector<2x32xf32>
    %200 = vector.extract_strided_slice %197 {offsets = [0, 96], sizes = [2, 32], strides = [1, 1]} : vector<2x128xf32> to vector<2x32xf32>
    %201 = vector.extract_strided_slice %192 {offsets = [0, 64], sizes = [2, 32], strides = [1, 1]} : vector<2x128xf32> to vector<2x32xf32>
    %202 = math.tanh %201 : vector<2x32xf32>
    %203 = arith.mulf %199, %187 : vector<2x32xf32>
    %204 = arith.mulf %198, %202 : vector<2x32xf32>
    %205 = arith.addf %203, %204 : vector<2x32xf32>
    %206 = math.tanh %205 : vector<2x32xf32>
    %207 = arith.mulf %200, %206 : vector<2x32xf32>
    %208 = vector.extract_strided_slice %169 {offsets = [4, 0], sizes = [2, 128], strides = [1, 1]} : vector<16x128xf32> to vector<2x128xf32>
    %cst_49 = arith.constant dense<0.000000e+00> : vector<2x128xf32>
    %209 = tpu.matmul %207, %164, %cst_49 {dimension_numbers = #tpu.dot_dimension_numbers<[1], [0], [0], [1], [0, 0, 1, 1], [], []>} : vector<2x32xf32>, vector<32x128xf32>, vector<2x128xf32> -> vector<2x128xf32>
    %210 = arith.addf %208, %209 : vector<2x128xf32>
    %211 = arith.negf %210 : vector<2x128xf32>
    %212 = math.exp %211 : vector<2x128xf32>
    %cst_50 = arith.constant 1.000000e+00 : f32
    %213 = vector.broadcast %cst_50 : f32 to vector<2x128xf32>
    %214 = arith.addf %213, %212 : vector<2x128xf32>
    %215 = arith.divf %213, %214 : vector<2x128xf32>
    %216 = vector.extract_strided_slice %215 {offsets = [0, 0], sizes = [2, 32], strides = [1, 1]} : vector<2x128xf32> to vector<2x32xf32>
    %217 = vector.extract_strided_slice %215 {offsets = [0, 32], sizes = [2, 32], strides = [1, 1]} : vector<2x128xf32> to vector<2x32xf32>
    %218 = vector.extract_strided_slice %215 {offsets = [0, 96], sizes = [2, 32], strides = [1, 1]} : vector<2x128xf32> to vector<2x32xf32>
    %219 = vector.extract_strided_slice %210 {offsets = [0, 64], sizes = [2, 32], strides = [1, 1]} : vector<2x128xf32> to vector<2x32xf32>
    %220 = math.tanh %219 : vector<2x32xf32>
    %221 = arith.mulf %217, %205 : vector<2x32xf32>
    %222 = arith.mulf %216, %220 : vector<2x32xf32>
    %223 = arith.addf %221, %222 : vector<2x32xf32>
    %224 = math.tanh %223 : vector<2x32xf32>
    %225 = arith.mulf %218, %224 : vector<2x32xf32>
    %226 = vector.extract_strided_slice %169 {offsets = [6, 0], sizes = [2, 128], strides = [1, 1]} : vector<16x128xf32> to vector<2x128xf32>
    %cst_51 = arith.constant dense<0.000000e+00> : vector<2x128xf32>
    %227 = tpu.matmul %225, %164, %cst_51 {dimension_numbers = #tpu.dot_dimension_numbers<[1], [0], [0], [1], [0, 0, 1, 1], [], []>} : vector<2x32xf32>, vector<32x128xf32>, vector<2x128xf32> -> vector<2x128xf32>
    %228 = arith.addf %226, %227 : vector<2x128xf32>
    %229 = arith.negf %228 : vector<2x128xf32>
    %230 = math.exp %229 : vector<2x128xf32>
    %cst_52 = arith.constant 1.000000e+00 : f32
    %231 = vector.broadcast %cst_52 : f32 to vector<2x128xf32>
    %232 = arith.addf %231, %230 : vector<2x128xf32>
    %233 = arith.divf %231, %232 : vector<2x128xf32>
    %234 = vector.extract_strided_slice %233 {offsets = [0, 0], sizes = [2, 32], strides = [1, 1]} : vector<2x128xf32> to vector<2x32xf32>
    %235 = vector.extract_strided_slice %233 {offsets = [0, 32], sizes = [2, 32], strides = [1, 1]} : vector<2x128xf32> to vector<2x32xf32>
    %236 = vector.extract_strided_slice %233 {offsets = [0, 96], sizes = [2, 32], strides = [1, 1]} : vector<2x128xf32> to vector<2x32xf32>
    %237 = vector.extract_strided_slice %228 {offsets = [0, 64], sizes = [2, 32], strides = [1, 1]} : vector<2x128xf32> to vector<2x32xf32>
    %238 = math.tanh %237 : vector<2x32xf32>
    %239 = arith.mulf %235, %223 : vector<2x32xf32>
    %240 = arith.mulf %234, %238 : vector<2x32xf32>
    %241 = arith.addf %239, %240 : vector<2x32xf32>
    %242 = math.tanh %241 : vector<2x32xf32>
    %243 = arith.mulf %236, %242 : vector<2x32xf32>
    %244 = vector.extract_strided_slice %169 {offsets = [8, 0], sizes = [2, 128], strides = [1, 1]} : vector<16x128xf32> to vector<2x128xf32>
    %cst_53 = arith.constant dense<0.000000e+00> : vector<2x128xf32>
    %245 = tpu.matmul %243, %164, %cst_53 {dimension_numbers = #tpu.dot_dimension_numbers<[1], [0], [0], [1], [0, 0, 1, 1], [], []>} : vector<2x32xf32>, vector<32x128xf32>, vector<2x128xf32> -> vector<2x128xf32>
    %246 = arith.addf %244, %245 : vector<2x128xf32>
    %247 = arith.negf %246 : vector<2x128xf32>
    %248 = math.exp %247 : vector<2x128xf32>
    %cst_54 = arith.constant 1.000000e+00 : f32
    %249 = vector.broadcast %cst_54 : f32 to vector<2x128xf32>
    %250 = arith.addf %249, %248 : vector<2x128xf32>
    %251 = arith.divf %249, %250 : vector<2x128xf32>
    %252 = vector.extract_strided_slice %251 {offsets = [0, 0], sizes = [2, 32], strides = [1, 1]} : vector<2x128xf32> to vector<2x32xf32>
    %253 = vector.extract_strided_slice %251 {offsets = [0, 32], sizes = [2, 32], strides = [1, 1]} : vector<2x128xf32> to vector<2x32xf32>
    %254 = vector.extract_strided_slice %251 {offsets = [0, 96], sizes = [2, 32], strides = [1, 1]} : vector<2x128xf32> to vector<2x32xf32>
    %255 = vector.extract_strided_slice %246 {offsets = [0, 64], sizes = [2, 32], strides = [1, 1]} : vector<2x128xf32> to vector<2x32xf32>
    %256 = math.tanh %255 : vector<2x32xf32>
    %257 = arith.mulf %253, %241 : vector<2x32xf32>
    %258 = arith.mulf %252, %256 : vector<2x32xf32>
    %259 = arith.addf %257, %258 : vector<2x32xf32>
    %260 = math.tanh %259 : vector<2x32xf32>
    %261 = arith.mulf %254, %260 : vector<2x32xf32>
    %262 = vector.extract_strided_slice %169 {offsets = [10, 0], sizes = [2, 128], strides = [1, 1]} : vector<16x128xf32> to vector<2x128xf32>
    %cst_55 = arith.constant dense<0.000000e+00> : vector<2x128xf32>
    %263 = tpu.matmul %261, %164, %cst_55 {dimension_numbers = #tpu.dot_dimension_numbers<[1], [0], [0], [1], [0, 0, 1, 1], [], []>} : vector<2x32xf32>, vector<32x128xf32>, vector<2x128xf32> -> vector<2x128xf32>
    %264 = arith.addf %262, %263 : vector<2x128xf32>
    %265 = arith.negf %264 : vector<2x128xf32>
    %266 = math.exp %265 : vector<2x128xf32>
    %cst_56 = arith.constant 1.000000e+00 : f32
    %267 = vector.broadcast %cst_56 : f32 to vector<2x128xf32>
    %268 = arith.addf %267, %266 : vector<2x128xf32>
    %269 = arith.divf %267, %268 : vector<2x128xf32>
    %270 = vector.extract_strided_slice %269 {offsets = [0, 0], sizes = [2, 32], strides = [1, 1]} : vector<2x128xf32> to vector<2x32xf32>
    %271 = vector.extract_strided_slice %269 {offsets = [0, 32], sizes = [2, 32], strides = [1, 1]} : vector<2x128xf32> to vector<2x32xf32>
    %272 = vector.extract_strided_slice %269 {offsets = [0, 96], sizes = [2, 32], strides = [1, 1]} : vector<2x128xf32> to vector<2x32xf32>
    %273 = vector.extract_strided_slice %264 {offsets = [0, 64], sizes = [2, 32], strides = [1, 1]} : vector<2x128xf32> to vector<2x32xf32>
    %274 = math.tanh %273 : vector<2x32xf32>
    %275 = arith.mulf %271, %259 : vector<2x32xf32>
    %276 = arith.mulf %270, %274 : vector<2x32xf32>
    %277 = arith.addf %275, %276 : vector<2x32xf32>
    %278 = math.tanh %277 : vector<2x32xf32>
    %279 = arith.mulf %272, %278 : vector<2x32xf32>
    %280 = vector.extract_strided_slice %169 {offsets = [12, 0], sizes = [2, 128], strides = [1, 1]} : vector<16x128xf32> to vector<2x128xf32>
    %cst_57 = arith.constant dense<0.000000e+00> : vector<2x128xf32>
    %281 = tpu.matmul %279, %164, %cst_57 {dimension_numbers = #tpu.dot_dimension_numbers<[1], [0], [0], [1], [0, 0, 1, 1], [], []>} : vector<2x32xf32>, vector<32x128xf32>, vector<2x128xf32> -> vector<2x128xf32>
    %282 = arith.addf %280, %281 : vector<2x128xf32>
    %283 = arith.negf %282 : vector<2x128xf32>
    %284 = math.exp %283 : vector<2x128xf32>
    %cst_58 = arith.constant 1.000000e+00 : f32
    %285 = vector.broadcast %cst_58 : f32 to vector<2x128xf32>
    %286 = arith.addf %285, %284 : vector<2x128xf32>
    %287 = arith.divf %285, %286 : vector<2x128xf32>
    %288 = vector.extract_strided_slice %287 {offsets = [0, 0], sizes = [2, 32], strides = [1, 1]} : vector<2x128xf32> to vector<2x32xf32>
    %289 = vector.extract_strided_slice %287 {offsets = [0, 32], sizes = [2, 32], strides = [1, 1]} : vector<2x128xf32> to vector<2x32xf32>
    %290 = vector.extract_strided_slice %287 {offsets = [0, 96], sizes = [2, 32], strides = [1, 1]} : vector<2x128xf32> to vector<2x32xf32>
    %291 = vector.extract_strided_slice %282 {offsets = [0, 64], sizes = [2, 32], strides = [1, 1]} : vector<2x128xf32> to vector<2x32xf32>
    %292 = math.tanh %291 : vector<2x32xf32>
    %293 = arith.mulf %289, %277 : vector<2x32xf32>
    %294 = arith.mulf %288, %292 : vector<2x32xf32>
    %295 = arith.addf %293, %294 : vector<2x32xf32>
    %296 = math.tanh %295 : vector<2x32xf32>
    %297 = arith.mulf %290, %296 : vector<2x32xf32>
    %298 = vector.extract_strided_slice %169 {offsets = [14, 0], sizes = [2, 128], strides = [1, 1]} : vector<16x128xf32> to vector<2x128xf32>
    %cst_59 = arith.constant dense<0.000000e+00> : vector<2x128xf32>
    %299 = tpu.matmul %297, %164, %cst_59 {dimension_numbers = #tpu.dot_dimension_numbers<[1], [0], [0], [1], [0, 0, 1, 1], [], []>} : vector<2x32xf32>, vector<32x128xf32>, vector<2x128xf32> -> vector<2x128xf32>
    %300 = arith.addf %298, %299 : vector<2x128xf32>
    %301 = arith.negf %300 : vector<2x128xf32>
    %302 = math.exp %301 : vector<2x128xf32>
    %cst_60 = arith.constant 1.000000e+00 : f32
    %303 = vector.broadcast %cst_60 : f32 to vector<2x128xf32>
    %304 = arith.addf %303, %302 : vector<2x128xf32>
    %305 = arith.divf %303, %304 : vector<2x128xf32>
    %306 = vector.extract_strided_slice %305 {offsets = [0, 0], sizes = [2, 32], strides = [1, 1]} : vector<2x128xf32> to vector<2x32xf32>
    %307 = vector.extract_strided_slice %305 {offsets = [0, 32], sizes = [2, 32], strides = [1, 1]} : vector<2x128xf32> to vector<2x32xf32>
    %308 = vector.extract_strided_slice %305 {offsets = [0, 96], sizes = [2, 32], strides = [1, 1]} : vector<2x128xf32> to vector<2x32xf32>
    %309 = vector.extract_strided_slice %300 {offsets = [0, 64], sizes = [2, 32], strides = [1, 1]} : vector<2x128xf32> to vector<2x32xf32>
    %310 = math.tanh %309 : vector<2x32xf32>
    %311 = arith.mulf %307, %295 : vector<2x32xf32>
    %312 = arith.mulf %306, %310 : vector<2x32xf32>
    %313 = arith.addf %311, %312 : vector<2x32xf32>
    %314 = math.tanh %313 : vector<2x32xf32>
    %315 = arith.mulf %308, %314 : vector<2x32xf32>
    %c0_61 = arith.constant 0 : index
    %c0_62 = arith.constant 0 : index
    %316 = vector.load %arg7[%c0_61, %c0_62] : memref<1x32xf32, #tpu.memory_space<vmem>>, vector<1x32xf32>
    %317 = vector.broadcast %316 : vector<1x32xf32> to vector<2x32xf32>
    %318 = arith.mulf %315, %317 : vector<2x32xf32>
    %cst_63 = arith.constant dense<0.000000e+00> : vector<2xf32>
    %319 = vector.multi_reduction <add>, %318, %cst_63 [1] : vector<2x32xf32> to vector<2xf32>
    %320 = vector.shape_cast %319 : vector<2xf32> to vector<2x1xf32>
    %c0_64 = arith.constant 0 : index
    %c0_65 = arith.constant 0 : index
    %321 = vector.load %arg8[%c0_64, %c0_65] : memref<1x1xf32, #tpu.memory_space<vmem>>, vector<1x1xf32>
    %322 = vector.broadcast %321 : vector<1x1xf32> to vector<2x1xf32>
    %323 = arith.addf %320, %322 : vector<2x1xf32>
    %c0_66 = arith.constant 0 : index
    %c0_67 = arith.constant 0 : index
    %324 = vector.load %arg10[%c0_66, %c0_67] : memref<2x1xf32, #tpu.memory_space<vmem>>, vector<2x1xf32>
    tpu.vector_store %arg10[%c0_66, %c0_67], %323 {strides = array<i32>} : memref<2x1xf32, #tpu.memory_space<vmem>>, vector<2x1xf32>,
    %325 = arith.negf %323 : vector<2x1xf32>
    %326 = math.exp %325 : vector<2x1xf32>
    %cst_68 = arith.constant 1.000000e+00 : f32
    %327 = vector.broadcast %cst_68 : f32 to vector<2x1xf32>
    %328 = arith.addf %327, %326 : vector<2x1xf32>
    %329 = arith.divf %327, %328 : vector<2x1xf32>
    %c0_69 = arith.constant 0 : index
    %c0_70 = arith.constant 0 : index
    %330 = vector.load %arg9[%c0_69, %c0_70] : memref<2x1xf32, #tpu.memory_space<vmem>>, vector<2x1xf32>
    tpu.vector_store %arg9[%c0_69, %c0_70], %329 {strides = array<i32>} : memref<2x1xf32, #tpu.memory_space<vmem>>, vector<2x1xf32>,
    return
  }
}

</mosaic_0001>

<bundles_post_ra>
// kernel: sentiment_lstm_forward.1
= control target key start
LH: loop header
LB: loop body
LE: loop exit
PB: predicated region body
PF: predicated region fallthrough
CT: control target
= control target key end

     0   :  { %s2999_s0 = inlined_call_operand.vmem [shape: f32[16,8], index: 0, kind: input, shape index: {}]   ;;  %s3000_s1 = inlined_call_operand.vmem [shape: f32[8,128], index: 1, kind: input, shape index: {}]   ;;  %s3001_s2 = inlined_call_operand.vmem [shape: f32[32,128], index: 2, kind: input, shape index: {}]   ;;  %s3002_s3 = inlined_call_operand.vmem [shape: f32[1,128], index: 3, kind: input, shape index: {}]   ;;  %s3003_s4 = inlined_call_operand.hbm [shape: f32[32,128], index: 4, kind: input, shape index: {}]   ;;  %s3004_s5 = inlined_call_operand.hbm [shape: f32[32,128], index: 5, kind: input, shape index: {}]   ;;  %s3005_s6 = inlined_call_operand.vmem [shape: f32[1,128], index: 6, kind: input, shape index: {}]   ;;  %s3006_s7 = inlined_call_operand.vmem [shape: f32[1,32], index: 7, kind: input, shape index: {}]   ;;  %s3007_s8 = inlined_call_operand.<no memory space> [shape: f32[1,1], index: 8, kind: input, shape index: {}]   ;;  %s3008_s9 = inlined_call_operand.vmem [shape: f32[2,1], index: 9, kind: output, shape index: {0}]   ;;  %s3009_s10 = inlined_call_operand.vmem [shape: f32[2,1], index: 10, kind: output, shape index: {1}]  }
   0x1   :  { %v16_v0 = vstv %s3007_s8 }
   0x2   :  { %17 = vst [vmem:[#allocation3] sm:$0x1] %v16_v0 }
   0x3   :  { %18 = vsyncpa [#allocation5], 0 }
   0x4   :  { %19 = vsyncpa [#allocation7], 0  ;;  %s2631_s15 = smov [#allocation4]   ;;  %s2583_s19 = scalar_lea.hbm %s3003_s4, 512 }
   0x5   :  { %s33_s16 = sshll.u32 %s2631_s15, 4  ;;  %p2584_p0 = scmp.ne.s32.totalorder %s3003_s4, %s2583_s19  ;;  %s34_s16 = int_to_ptr.vmem [resolvable:$true] %s33_s16 }
   0x6   :  { %p2587_p1 = scmp.lt.u32.totalorder %s2583_s19, %s3003_s4 }
   0x8   :  { %p2589_p2 = pnand %p2587_p1, %p2584_p0 }
   0xa   :  { %2592 = shalt.err (!%p2589_p2)
}
   0xb   :  { %s2593_s8 = scalar_lea.vmem %s34_s16, 512  ;;  %p2598_p4 = scmp.lt.s32.totalorder %s34_s16, %s34_s16 }
   0xc   :  { %p2594_p3 = scmp.ne.s32.totalorder %s34_s16, %s2593_s8  ;;  %p2599_p5 = scmp.lt.s32.totalorder %s2593_s8, %s2593_s8 }
   0xe   :  { %p2600_p6 = por %p2599_p5, %p2598_p4 }
  0x10   :  { %p2601_p7 = pnand %p2600_p6, %p2594_p3 }
  0x12   :  { %2604 = shalt.err (!%p2601_p7)
}
  0x13   :  { %s2632_s24 = smov 128   ;;  %s2633_s25 = smov 8  }
  0x14   :  { %39 = dma.hbm_to_vmem [thread:$0]  %s3003_s4, 512, %s34_s16, [#allocation5], %s2632_s24, %s2632_s24, %s2633_s25  }
  0x15   :  { %s2634_s28 = smov [#allocation6]   ;;  %s2605_s12 = scalar_lea.hbm %s3004_s5, 512 }
  0x16   :  { %s45_s29 = sshll.u32 %s2634_s28, 4  ;;  %p2606_p8 = scmp.ne.s32.totalorder %s3004_s5, %s2605_s12  ;;  %s46_s29 = int_to_ptr.vmem [resolvable:$true] %s45_s29 }
  0x17   :  { %p2609_p9 = scmp.lt.u32.totalorder %s2605_s12, %s3004_s5 }
  0x19   :  { %p2611_p10 = pnand %p2609_p9, %p2606_p8 }
  0x1b   :  { %2614 = shalt.err (!%p2611_p10)
}
  0x1c   :  { %s2615_s18 = scalar_lea.vmem %s46_s29, 512  ;;  %p2620_p12 = scmp.lt.s32.totalorder %s46_s29, %s46_s29 }
  0x1d   :  { %p2616_p11 = scmp.ne.s32.totalorder %s46_s29, %s2615_s18  ;;  %p2621_p13 = scmp.lt.s32.totalorder %s2615_s18, %s2615_s18 }
  0x1f   :  { %p2622_p0 = por %p2621_p13, %p2620_p12 }
  0x21   :  { %p2623_p1 = pnand %p2622_p0, %p2616_p11 }
  0x23   :  { %2626 = shalt.err (!%p2623_p1)
}
  0x24   :  { %51 = dma.hbm_to_vmem [thread:$0]  %s3004_s5, 512, %s46_s29, [#allocation7], %s2632_s24, %s2632_s24, %s2633_s25  }
  0x25   :  { %2627 = dma.done.wait [#allocation5], 512  }
  0x26   :  { %2628 = vsyncadd [#allocation5], 4294966784 }
  0x27   :  { %2629 = dma.done.wait [#allocation7], 512  }
  0x28   :  { %2630 = vsyncadd [#allocation7], 4294966784  ;;  %v2635_v1 = vmov 0.0|0.0   ;;  %vm2636_vm0 = vmmov 0   ;;  %v2637_v2 = vmov 0.0   ;;  %vm78_vm1 = vcmask 64512  }
  0x29   :  { %2337 = vmatprep.subr.bf16.mxu1 %v2635_v1  ;;  %2158 = vmatprep.mubr.msk.f32.mxu1 %vm2636_vm0, %v2637_v2  ;;  %v67_v3 = vld [vmem:[%s3001_s2] sm:$0xff]  ;;  %v68_v4 = vld [vmem:[%s3001_s2 + $0x8] sm:$0xff]  ;;  %v69_v9 = vld [vmem:[%s3001_s2 + $0x10] sm:$0xff]  ;;  %vm263_vm2 = vcmask 254976   ;;  %vm160_vm3 = vcmask 261120   ;;  %vm372_vm4 = vcmask 257026  }
  0x2a   :  { %v66_v5 = vld [vmem:[%s3000_s1] sm:$0xff]  ;;  %v2735_v6 = vpack.c.bf16 %v68_v4, %v67_v3  ;;  %v65_v8 = vld [vmem:[%s2999_s0 + $0x8] sm:$0xff]  ;;  %v70_v10 = vld [vmem:[%s3001_s2 + $0x18] sm:$0xff]  ;;  %s2638_s2 = smov 64   ;;  %vm596_vm5 = vcmask 261126   ;;  %vm484_vm6 = vcmask 259076  }
  0x2b   :  { %2145 = vmatprep.subr.mxu0 %v66_v5  ;;  %v64_v7 = vld [vmem:[%s2999_s0] sm:$0xff]  ;;  %v2750_v11 = vpack.c.bf16 %v70_v10, %v69_v9  ;;  %s2640_s14 = smov 96   ;;  %vm1998_vm7 = vcmask 7174  }
  0x2c   :  { %2146 = vmatpush3.msra.mxu0 %v66_v5  ;;  %2147 = vmatprep.mubr.msk.f32.mxu0 %vm78_vm1, %v64_v7  ;;  %v2017_v12 = vld [vmem:[%s3002_s3] ss:$0 sm:$0xff]  ;;  %s2639_s3 = smov 32  }
  0x2d   :  { %2339 = vmatpush3.bf16.msra.mxu1 %v2735_v6  ;;  %2148 = vmatmul.mubr.msk.f32.vlgmr.msra.gmra.mrb[0].mxu0 %vm78_vm1, %v65_v8 }
  0x2e   :  { %2340 = vmatprep.subr.bf16.mxu1 %v2635_v1  ;;  %2343 = vmatprep.subr.bf16.mxu0 %v2635_v1 }
  0x2f   :  { %2345 = vmatpush3.bf16.msra.mxu0 %v2735_v6  ;;  %2169 = vmatprep.mubr.msk.f32.mxu0 %vm2636_vm0, %v2637_v2 }
  0x30   :  { %2346 = vmatprep.subr.bf16.mxu0 %v2635_v1 }
  0x31   :  { %2342 = vmatpush3.bf16.msra.mxu1 %v2750_v11 }
  0x32   :  { %2349 = vmatprep.subr.bf16.mxu1 %v2635_v1 }
  0x33   :  { %2348 = vmatpush3.bf16.msra.mxu0 %v2750_v11 }
  0x34   :  { %2159 = vmatmul.mubr.f32.vlgmr.msra.gmra.mrb[0].mxu1 %v2637_v2  ;;  %2355 = vmatprep.subr.bf16.mxu0 %v2635_v1 }
  0x35   :  { %2351 = vmatpush3.bf16.msra.mxu1 %v2735_v6  ;;  %2180 = vmatprep.mubr.msk.f32.mxu1 %vm2636_vm0, %v2637_v2 }
  0x36   :  { %2352 = vmatprep.subr.bf16.mxu1 %v2635_v1 }
  0x39   :  { %2354 = vmatpush3.bf16.msra.mxu1 %v2750_v11 }
  0x3a   :  { %2361 = vmatprep.subr.bf16.mxu1 %v2635_v1 }
 0x100   :  { %v2149_v13 = vpop.f32.mrb[0].mxu0 }
 0x101   :  { %v2772_v14 = vadd.f32 %v2149_v13, %v2017_v12  ;;  %v151_v15 = vpop.f32.mrb[1].mxu0 }
 0x102   :  { %v2774_v16 = vadd.f32 %v2017_v12, %v151_v15 }
 0x107   :  { %v230_v17 = vpop.f32.mrb[0].mxu1 }
 0x108   :  { %v234_v18 = vadd.f32 %v230_v17, %v2774_v16  ;;  %v2160_v19 = vpop.f32.mrb[1].mxu1 }
 0x10a   :  { %2451 = vtanh.f32 %v234_v18  ;;  %v2020_v21 = vmul.f32 -1.442695, %v234_v18 }
 0x10c   :  { %2453 = vpow2.f32 %v2020_v21 }
 0x114   :  { %v2452_v20 = vpop.eup %2451 }
 0x115   :  { %244 = vrot.lane.b32.xlu0 %v2452_v20, %s2638_s2 }
 0x116   :  { %v2454_v22 = vpop.eup %2453 }
 0x117   :  { %v238_v23 = vadd.f32 1.0, %v2454_v22 }
 0x119   :  { %2455 = vrcp.f32 %v238_v23 }
 0x123   :  { %v2456_v24 = vpop.eup %2455 }
 0x124   :  { %v242_v27 = vmul.f32 0.0, %v2456_v24 }
 0x187   :  { %v245_v25 = vpop.permute.xlu0 %244 }
 0x188   :  { %v247_v26 = vmul.f32 %v2456_v24, %v245_v25 }
 0x18a   :  { %249 = vrot.lane.b32.xlu0 %v247_v26, %s2639_s3 }
 0x1fc   :  { %v250_v28 = vpop.permute.xlu0 %249 }
 0x1fd   :  { %v252_v29 = vadd.f32 %v250_v28, %v242_v27 }
 0x1ff   :  { %2457 = vtanh.f32 %v252_v29  ;;  %v349_v45 = vrot.slane %v252_v29, 6 }
 0x209   :  { %v2458_v30 = vpop.eup %2457 }
 0x20a   :  { %255 = vrot.lane.b32.xlu1 %v2458_v30, %s2638_s2 }
 0x27c   :  { %v256_v31 = vpop.permute.xlu1 %255 }
 0x27d   :  { %v258_v32 = vmul.f32 %v2456_v24, %v256_v31 }
 0x27f   :  { %260 = vrot.lane.b32.xlu1 %v258_v32, %s2639_s3 }
 0x2f1   :  { %v261_v33 = vpop.permute.xlu1 %260 }
 0x2f2   :  { %264 = vst.msk [vmem:[#allocation2] sm:$0x3] %vm263_vm2, %v261_v33  ;;  %2170 = vmatmul.mubr.msk.f32.vlgmr.msra.gmra.mrb[2].mxu0 %vm160_vm3, %v261_v33 }
 0x2f3   :  { %2357 = vmatpush3.bf16.msra.mxu0 %v2735_v6  ;;  %2191 = vmatprep.mubr.msk.f32.mxu0 %vm2636_vm0, %v2637_v2 }
 0x2f4   :  { %2358 = vmatprep.subr.bf16.mxu0 %v2635_v1 }
 0x2f7   :  { %2360 = vmatpush3.bf16.msra.mxu0 %v2750_v11 }
 0x2f8   :  { %2367 = vmatprep.subr.bf16.mxu0 %v2635_v1 }
 0x3c5   :  { %v333_v34 = vpop.f32.mrb[2].mxu0 }
 0x3c6   :  { %v338_v35 = vrot.slane %v333_v34, 6  ;;  %v2171_v36 = vpop.f32.mrb[3].mxu0 }
 0x3c8   :  { %v340_v37 = vadd.f32 %v338_v35, %v2774_v16 }
 0x3ca   :  { %2459 = vtanh.f32 %v340_v37  ;;  %v2022_v39 = vmul.f32 -1.442695, %v340_v37 }
 0x3cc   :  { %2461 = vpow2.f32 %v2022_v39 }
 0x3d4   :  { %v2460_v38 = vpop.eup %2459 }
 0x3d5   :  { %353 = vrot.lane.b32.xlu0 %v2460_v38, %s2638_s2 }
 0x3d6   :  { %v2462_v40 = vpop.eup %2461 }
 0x3d7   :  { %v344_v41 = vadd.f32 1.0, %v2462_v40 }
 0x3d9   :  { %2463 = vrcp.f32 %v344_v41 }
 0x3e3   :  { %v2464_v42 = vpop.eup %2463 }
 0x3e4   :  { %v351_v46 = vmul.f32 %v2464_v42, %v349_v45 }
 0x447   :  { %v354_v43 = vpop.permute.xlu0 %353 }
 0x448   :  { %v356_v44 = vmul.f32 %v2464_v42, %v354_v43 }
 0x44a   :  { %358 = vrot.lane.b32.xlu1 %v356_v44, %s2639_s3 }
 0x4bc   :  { %v359_v47 = vpop.permute.xlu1 %358 }
 0x4bd   :  { %v361_v48 = vadd.f32 %v359_v47, %v351_v46 }
 0x4bf   :  { %2465 = vtanh.f32 %v361_v48  ;;  %v461_v3 = vrot.slane %v361_v48, 6 }
 0x4c9   :  { %v2466_v49 = vpop.eup %2465 }
 0x4ca   :  { %364 = vrot.lane.b32.xlu0 %v2466_v49, %s2638_s2 }
 0x53c   :  { %v365_v50 = vpop.permute.xlu0 %364 }
 0x53d   :  { %v2793_v51 = vmul.f32 %v2464_v42, %v365_v50 }
 0x53f   :  { %v374_v52 = vrot.slane %v2793_v51, 2 }
 0x541   :  { %375 = vrot.lane.b32.xlu1 %v374_v52, %s2639_s3 }
 0x5b3   :  { %v376_v53 = vpop.permute.xlu1 %375 }
 0x5b4   :  { %2181 = vmatmul.mubr.msk.f32.vlgmr.msra.gmra.mrb[2].mxu1 %vm160_vm3, %v376_v53 }
 0x5b5   :  { %2363 = vmatpush3.bf16.msra.mxu1 %v2735_v6  ;;  %2202 = vmatprep.mubr.msk.f32.mxu1 %vm2636_vm0, %v2637_v2 }
 0x5b6   :  { %2364 = vmatprep.subr.bf16.mxu1 %v2635_v1 }
 0x5b9   :  { %2366 = vmatpush3.bf16.msra.mxu1 %v2750_v11 }
 0x5ba   :  { %2373 = vmatprep.subr.bf16.mxu1 %v2635_v1 }
 0x687   :  { %v445_v54 = vpop.f32.mrb[2].mxu1 }
 0x688   :  { %v450_v55 = vrot.slane %v445_v54, 4  ;;  %v2182_v56 = vpop.f32.mrb[3].mxu1 }
 0x68a   :  { %v452_v57 = vadd.f32 %v450_v55, %v2774_v16 }
 0x68c   :  { %2467 = vtanh.f32 %v452_v57  ;;  %v2024_v59 = vmul.f32 -1.442695, %v452_v57 }
 0x68e   :  { %2469 = vpow2.f32 %v2024_v59 }
 0x696   :  { %v2468_v58 = vpop.eup %2467 }
 0x697   :  { %465 = vrot.lane.b32.xlu0 %v2468_v58, %s2638_s2 }
 0x698   :  { %v2470_v60 = vpop.eup %2469 }
 0x699   :  { %v456_v61 = vadd.f32 1.0, %v2470_v60 }
 0x69b   :  { %2471 = vrcp.f32 %v456_v61 }
 0x6a5   :  { %v2472_v62 = vpop.eup %2471 }
 0x6a6   :  { %v463_v4 = vmul.f32 %v2472_v62, %v461_v3 }
 0x709   :  { %v466_v63 = vpop.permute.xlu0 %465 }
 0x70a   :  { %v468_v0 = vmul.f32 %v2472_v62, %v466_v63 }
 0x70c   :  { %470 = vrot.lane.b32.xlu1 %v468_v0, %s2639_s3 }
 0x77e   :  { %v471_v5 = vpop.permute.xlu1 %470 }
 0x77f   :  { %v473_v7 = vadd.f32 %v471_v5, %v463_v4 }
 0x781   :  { %2473 = vtanh.f32 %v473_v7  ;;  %v573_v27 = vrot.slane %v473_v7, 6 }
 0x78b   :  { %v2474_v8 = vpop.eup %2473 }
 0x78c   :  { %476 = vrot.lane.b32.xlu0 %v2474_v8, %s2638_s2 }
 0x7fe   :  { %v477_v9 = vpop.permute.xlu0 %476 }
 0x7ff   :  { %v2808_v10 = vmul.f32 %v2472_v62, %v477_v9 }
 0x801   :  { %v486_v12 = vrot.slane %v2808_v10, 4 }
 0x803   :  { %487 = vrot.lane.b32.xlu1 %v486_v12, %s2639_s3 }
 0x875   :  { %v488_v13 = vpop.permute.xlu1 %487 }
 0x876   :  { %2192 = vmatmul.mubr.msk.f32.vlgmr.msra.gmra.mrb[4].mxu0 %vm160_vm3, %v488_v13 }
 0x877   :  { %2369 = vmatpush3.bf16.msra.mxu0 %v2735_v6  ;;  %2213 = vmatprep.mubr.msk.f32.mxu0 %vm2636_vm0, %v2637_v2 }
 0x878   :  { %2370 = vmatprep.subr.bf16.mxu0 %v2635_v1 }
 0x87b   :  { %2372 = vmatpush3.bf16.msra.mxu0 %v2750_v11 }
 0x87c   :  { %2379 = vmatprep.subr.bf16.mxu0 %v2635_v1 }
 0x949   :  { %v557_v15 = vpop.f32.mrb[4].mxu0 }
 0x94a   :  { %v562_v17 = vrot.slane %v557_v15, 2  ;;  %v2193_v18 = vpop.f32.mrb[5].mxu0 }
 0x94c   :  { %v564_v19 = vadd.f32 %v562_v17, %v2774_v16 }
 0x94e   :  { %2475 = vtanh.f32 %v564_v19  ;;  %v2026_v21 = vmul.f32 -1.442695, %v564_v19 }
 0x950   :  { %2477 = vpow2.f32 %v2026_v21 }
 0x958   :  { %v2476_v20 = vpop.eup %2475 }
 0x959   :  { %577 = vrot.lane.b32.xlu0 %v2476_v20, %s2638_s2 }
 0x95a   :  { %v2478_v22 = vpop.eup %2477 }
 0x95b   :  { %v568_v23 = vadd.f32 1.0, %v2478_v22 }
 0x95d   :  { %2479 = vrcp.f32 %v568_v23 }
 0x967   :  { %v2480_v24 = vpop.eup %2479 }
 0x968   :  { %v575_v28 = vmul.f32 %v2480_v24, %v573_v27 }
 0x9cb   :  { %v578_v25 = vpop.permute.xlu0 %577 }
 0x9cc   :  { %v580_v26 = vmul.f32 %v2480_v24, %v578_v25 }
 0x9ce   :  { %582 = vrot.lane.b32.xlu1 %v580_v26, %s2639_s3 }
 0xa40   :  { %v583_v29 = vpop.permute.xlu1 %582 }
 0xa41   :  { %v585_v30 = vadd.f32 %v583_v29, %v575_v28 }
 0xa43   :  { %2481 = vtanh.f32 %v585_v30  ;;  %v682_v45 = vrot.slane %v585_v30, 6 }
 0xa4d   :  { %v2482_v16 = vpop.eup %2481 }
 0xa4e   :  { %588 = vrot.lane.b32.xlu0 %v2482_v16, %s2638_s2 }
 0xac0   :  { %v589_v31 = vpop.permute.xlu0 %588 }
 0xac1   :  { %v2823_v32 = vmul.f32 %v2480_v24, %v589_v31 }
 0xac3   :  { %v598_v33 = vrot.slane %v2823_v32, 6 }
 0xac5   :  { %599 = vrot.lane.b32.xlu1 %v598_v33, %s2639_s3 }
 0xb37   :  { %v600_v34 = vpop.permute.xlu1 %599 }
 0xb38   :  { %2203 = vmatmul.mubr.msk.f32.vlgmr.msra.gmra.mrb[4].mxu1 %vm160_vm3, %v600_v34 }
 0xb39   :  { %2375 = vmatpush3.bf16.msra.mxu1 %v2735_v6  ;;  %2224 = vmatprep.mubr.msk.f32.mxu1 %vm2636_vm0, %v2637_v2 }
 0xb3a   :  { %2376 = vmatprep.subr.bf16.mxu1 %v2635_v1 }
 0xb3d   :  { %2378 = vmatpush3.bf16.msra.mxu1 %v2750_v11 }
 0xc0b   :  { %v669_v35 = vpop.f32.mrb[4].mxu1 }
 0xc0c   :  { %v673_v36 = vadd.f32 %v669_v35, %v2772_v14  ;;  %v2204_v37 = vpop.f32.mrb[5].mxu1 }
 0xc0e   :  { %2483 = vtanh.f32 %v673_v36  ;;  %v2028_v39 = vmul.f32 -1.442695, %v673_v36 }
 0xc10   :  { %2485 = vpow2.f32 %v2028_v39 }
 0xc18   :  { %v2484_v38 = vpop.eup %2483 }
 0xc19   :  { %686 = vrot.lane.b32.xlu0 %v2484_v38, %s2638_s2 }
 0xc1a   :  { %v2486_v40 = vpop.eup %2485 }
 0xc1b   :  { %v677_v41 = vadd.f32 1.0, %v2486_v40 }
 0xc1d   :  { %2487 = vrcp.f32 %v677_v41 }
 0xc27   :  { %v2488_v42 = vpop.eup %2487 }
 0xc28   :  { %v684_v46 = vmul.f32 %v2488_v42, %v682_v45 }
 0xc8b   :  { %v687_v43 = vpop.permute.xlu0 %686 }
 0xc8c   :  { %v689_v44 = vmul.f32 %v2488_v42, %v687_v43 }
 0xc8e   :  { %691 = vrot.lane.b32.xlu1 %v689_v44, %s2639_s3 }
 0xd00   :  { %v692_v47 = vpop.permute.xlu1 %691 }
 0xd01   :  { %v694_v48 = vadd.f32 %v692_v47, %v684_v46 }
 0xd03   :  { %2489 = vtanh.f32 %v694_v48 }
 0xd0d   :  { %v2490_v49 = vpop.eup %2489 }
 0xd0e   :  { %697 = vrot.lane.b32.xlu0 %v2490_v49, %s2638_s2 }
 0xd80   :  { %v698_v50 = vpop.permute.xlu0 %697 }
 0xd81   :  { %v700_v52 = vmul.f32 %v2488_v42, %v698_v50 }
 0xd83   :  { %702 = vrot.lane.b32.xlu1 %v700_v52, %s2639_s3 }
 0xdf5   :  { %v703_v53 = vpop.permute.xlu1 %702 }
 0xdf6   :  { %705 = vst.msk [vmem:[#allocation2 + $0x8] sm:$0x3] %vm263_vm2, %v703_v53  ;;  %2214 = vmatmul.mubr.msk.f32.vlgmr.msra.gmra.mrb[6].mxu0 %vm160_vm3, %v703_v53  ;;  %v1039_v53 = vld [vmem:[#allocation4 + $0x8] sm:$0xff] }
 0xdf7   :  { %2381 = vmatpush3.bf16.msra.mxu0 %v2735_v6  ;;  %2235 = vmatprep.mubr.msk.f32.mxu0 %vm2636_vm0, %v2637_v2 }
 0xdf8   :  { %2382 = vmatprep.subr.bf16.mxu0 %v2635_v1 }
 0xdfb   :  { %2384 = vmatpush3.bf16.msra.mxu0 %v2750_v11  ;;  %v790_v11 = vrot.slane %v694_v48, 6 }
 0xdfc   :  { %2393 = vmatprep.subr.bf16.mxu0 %v2635_v1 }
 0xec9   :  { %v774_v54 = vpop.f32.mrb[6].mxu0 }
 0xeca   :  { %v779_v55 = vrot.slane %v774_v54, 6  ;;  %v2215_v56 = vpop.f32.mrb[7].mxu0 }
 0xecb   :  { %v1043_v56 = vld [vmem:[#allocation6 + $0x8] sm:$0xff] }
 0xecc   :  { %v781_v57 = vadd.f32 %v779_v55, %v2772_v14  ;;  %v1042_v55 = vld [vmem:[#allocation6] sm:$0xff] }
 0xece   :  { %2491 = vtanh.f32 %v781_v57  ;;  %v2030_v59 = vmul.f32 -1.442695, %v781_v57  ;;  %v1040_v57 = vld [vmem:[#allocation4 + $0x10] sm:$0xff] }
 0xed0   :  { %2493 = vpow2.f32 %v2030_v59  ;;  %v1041_v59 = vld [vmem:[#allocation4 + $0x18] sm:$0xff] }
 0xed8   :  { %v2492_v58 = vpop.eup %2491 }
 0xed9   :  { %794 = vrot.lane.b32.xlu0 %v2492_v58, %s2638_s2  ;;  %v2879_v58 = vpack.c.bf16 %v1043_v56, %v1042_v55 }
 0xeda   :  { %v2494_v6 = vpop.eup %2493 }
 0xedb   :  { %v785_v60 = vadd.f32 1.0, %v2494_v6  ;;  %v1044_v6 = vld [vmem:[#allocation6 + $0x10] sm:$0xff] }
 0xedd   :  { %2495 = vrcp.f32 %v785_v60  ;;  %v1045_v60 = vld [vmem:[#allocation6 + $0x18] sm:$0xff] }
 0xee7   :  { %v2496_v61 = vpop.eup %2495 }
 0xee8   :  { %v792_v0 = vmul.f32 %v2496_v61, %v790_v11 }
 0xf4b   :  { %v795_v62 = vpop.permute.xlu0 %794 }
 0xf4c   :  { %v797_v63 = vmul.f32 %v2496_v61, %v795_v62 }
 0xf4e   :  { %799 = vrot.lane.b32.xlu1 %v797_v63, %s2639_s3 }
 0xfc0   :  { %v800_v3 = vpop.permute.xlu1 %799 }
 0xfc1   :  { %v802_v4 = vadd.f32 %v800_v3, %v792_v0 }
 0xfc3   :  { %2497 = vtanh.f32 %v802_v4  ;;  %v901_v26 = vrot.slane %v802_v4, 6 }
 0xfcd   :  { %v2498_v5 = vpop.eup %2497 }
 0xfce   :  { %805 = vrot.lane.b32.xlu0 %v2498_v5, %s2638_s2 }
0x1040   :  { %v806_v7 = vpop.permute.xlu0 %805 }
0x1041   :  { %v2850_v8 = vmul.f32 %v2496_v61, %v806_v7  ;;  %v2389_v61 = vpack.c.bf16 %v1041_v59, %v1040_v57 }
0x1043   :  { %v814_v9 = vrot.slane %v2850_v8, 2 }
0x1045   :  { %815 = vrot.lane.b32.xlu1 %v814_v9, %s2639_s3  ;;  %v2035_v9 = vld [vmem:[%s3005_s6] ss:$0 sm:$0xff] }
0x10b7   :  { %v816_v12 = vpop.permute.xlu1 %815 }
0x10b8   :  { %2225 = vmatmul.mubr.msk.f32.vlgmr.msra.gmra.mrb[6].mxu1 %vm160_vm3, %v816_v12 }
0x118b   :  { %v885_v13 = vpop.f32.mrb[6].mxu1 }
0x118c   :  { %v890_v15 = vrot.slane %v885_v13, 4  ;;  %v2226_v17 = vpop.f32.mrb[7].mxu1 }
0x118e   :  { %v892_v18 = vadd.f32 %v890_v15, %v2772_v14 }
0x1190   :  { %2499 = vtanh.f32 %v892_v18  ;;  %v2032_v20 = vmul.f32 -1.442695, %v892_v18 }
0x1192   :  { %2501 = vpow2.f32 %v2032_v20 }
0x119a   :  { %v2500_v19 = vpop.eup %2499 }
0x119b   :  { %905 = vrot.lane.b32.xlu0 %v2500_v19, %s2638_s2 }
0x119c   :  { %v2502_v21 = vpop.eup %2501 }
0x119d   :  { %v896_v22 = vadd.f32 1.0, %v2502_v21 }
0x119f   :  { %2503 = vrcp.f32 %v896_v22 }
0x11a9   :  { %v2504_v23 = vpop.eup %2503 }
0x11aa   :  { %v903_v27 = vmul.f32 %v2504_v23, %v901_v26 }
0x120d   :  { %v906_v24 = vpop.permute.xlu0 %905 }
0x120e   :  { %v908_v25 = vmul.f32 %v2504_v23, %v906_v24 }
0x1210   :  { %910 = vrot.lane.b32.xlu1 %v908_v25, %s2639_s3 }
0x1282   :  { %v911_v28 = vpop.permute.xlu1 %910 }
0x1283   :  { %v913_v29 = vadd.f32 %v911_v28, %v903_v27 }
0x1285   :  { %2505 = vtanh.f32 %v913_v29 }
0x128f   :  { %v2506_v30 = vpop.eup %2505 }
0x1290   :  { %916 = vrot.lane.b32.xlu0 %v2506_v30, %s2638_s2 }
0x1302   :  { %v917_v16 = vpop.permute.xlu0 %916 }
0x1303   :  { %v919_v31 = vmul.f32 %v2504_v23, %v917_v16 }
0x1305   :  { %v925_v33 = vrot.slane %v919_v31, 4 }
0x1307   :  { %926 = vrot.lane.b32.xlu1 %v925_v33, %s2639_s3 }
0x1379   :  { %v927_v34 = vpop.permute.xlu1 %926 }
0x137a   :  { %2236 = vmatmul.mubr.msk.f32.vlgmr.msra.gmra.mrb[8].mxu0 %vm160_vm3, %v927_v34 }
0x137b   :  { %2257 = vmatprep.mubr.msk.f32.mxu0 %vm2636_vm0, %v2637_v2  ;;  %2395 = vmatpush3.bf16.msra.mxu0 %v2879_v58 }
0x137c   :  { %2396 = vmatprep.subr.bf16.mxu0 %v2635_v1 }
0x144d   :  { %v996_v35 = vpop.f32.mrb[8].mxu0 }
0x144e   :  { %v1001_v36 = vrot.slane %v996_v35, 2  ;;  %v2237_v37 = vpop.f32.mrb[9].mxu0 }
0x1450   :  { %v1003_v38 = vadd.f32 %v1001_v36, %v2772_v14  ;;  %v1012_v14 = vrot.slane %v913_v29, 6 }
0x1452   :  { %2507 = vtanh.f32 %v1003_v38  ;;  %v2034_v40 = vmul.f32 -1.442695, %v1003_v38 }
0x1454   :  { %2509 = vpow2.f32 %v2034_v40 }
0x145c   :  { %v2508_v39 = vpop.eup %2507 }
0x145d   :  { %1016 = vrot.lane.b32.xlu0 %v2508_v39, %s2638_s2 }
0x145e   :  { %v2510_v41 = vpop.eup %2509 }
0x145f   :  { %v1007_v42 = vadd.f32 1.0, %v2510_v41 }
0x1461   :  { %2511 = vrcp.f32 %v1007_v42 }
0x146b   :  { %v2512_v43 = vpop.eup %2511 }
0x146c   :  { %v1014_v46 = vmul.f32 %v2512_v43, %v1012_v14 }
0x14cf   :  { %v1017_v44 = vpop.permute.xlu0 %1016 }
0x14d0   :  { %v1019_v45 = vmul.f32 %v2512_v43, %v1017_v44 }
0x14d2   :  { %1021 = vrot.lane.b32.xlu1 %v1019_v45, %s2639_s3 }
0x14d6   :  { %369 = vrot.lane.b32.xlu1 %v2793_v51, %s2639_s3 }
0x14da   :  { %593 = vrot.lane.b32.xlu1 %v2823_v32, %s2639_s3  ;;  %v1038_v32 = vld [vmem:[#allocation4] sm:$0xff] }
0x14db   :  { %v2385_v54 = vpack.c.bf16 %v1039_v53, %v1038_v32 }
0x14dd   :  { %2386 = vmatprep.subr.bf16.mxu1 %v2385_v54 }
0x14de   :  { %921 = vrot.lane.b32.xlu1 %v919_v31, %s2639_s3  ;;  %2388 = vmatpush3.bf16.msra.mxu1 %v2385_v54 }
0x14df   :  { %2390 = vmatprep.subr.bf16.mxu1 %v2389_v61 }
0x14e2   :  { %2392 = vmatpush3.bf16.msra.mxu1 %v2389_v61 }
0x14e3   :  { %2399 = vmatprep.subr.bf16.mxu1 %v2635_v1 }
0x1544   :  { %v1022_v47 = vpop.permute.xlu1 %1021 }
0x1545   :  { %v1024_v48 = vadd.f32 %v1022_v47, %v1014_v46 }
0x1547   :  { %2513 = vtanh.f32 %v1024_v48 }
0x1548   :  { %v370_v49 = vpop.permute.xlu1 %369 }
0x1549   :  { %373 = vst.msk [vmem:[#allocation2] sm:$0xc] %vm372_vm4, %v370_v49 }
0x154c   :  { %v594_v50 = vpop.permute.xlu1 %593 }
0x154d   :  { %597 = vst.msk [vmem:[#allocation2] sm:$0xc0] %vm596_vm5, %v594_v50 }
0x1550   :  { %v922_v51 = vpop.permute.xlu1 %921 }
0x1551   :  { %v2514_v52 = vpop.eup %2513  ;;  %924 = vst.msk [vmem:[#allocation2 + $0x8] sm:$0x30] %vm484_vm6, %v922_v51 }
0x1552   :  { %1027 = vrot.lane.b32.xlu0 %v2514_v52, %s2638_s2 }
0x1556   :  { %481 = vrot.lane.b32.xlu0 %v2808_v10, %s2639_s3  ;;  %v2882_v10 = vpack.c.bf16 %v1045_v60, %v1044_v6 }
0x1558   :  { %2398 = vmatpush3.bf16.msra.mxu0 %v2882_v10 }
0x1559   :  { %2405 = vmatprep.subr.bf16.mxu0 %v2635_v1 }
0x155a   :  { %810 = vrot.lane.b32.xlu0 %v2850_v8, %s2639_s3 }
0x155b   :  { %2258 = vmatmul.mubr.f32.vlgmr.msra.gmra.mrb[10].mxu0 %v2637_v2 }
0x155c   :  { %2407 = vmatpush3.bf16.msra.mxu0 %v2879_v58  ;;  %2279 = vmatprep.mubr.msk.f32.mxu0 %vm2636_vm0, %v2637_v2 }
0x155d   :  { %2408 = vmatprep.subr.bf16.mxu0 %v2635_v1 }
0x1560   :  { %2410 = vmatpush3.bf16.msra.mxu0 %v2882_v10 }
0x1561   :  { %2417 = vmatprep.subr.bf16.mxu0 %v2635_v1 }
0x15c4   :  { %v1028_v62 = vpop.permute.xlu0 %1027 }
0x15c5   :  { %v1030_v63 = vmul.f32 %v2512_v43, %v1028_v62 }
0x15c7   :  { %1032 = vrot.lane.b32.xlu0 %v1030_v63, %s2639_s3 }
0x15c8   :  { %v482_v11 = vpop.permute.xlu0 %481 }
0x15c9   :  { %485 = vst.msk [vmem:[#allocation2] sm:$0x30] %vm484_vm6, %v482_v11 }
0x15cc   :  { %v811_v0 = vpop.permute.xlu0 %810 }
0x15cd   :  { %813 = vst.msk [vmem:[#allocation2 + $0x8] sm:$0xc] %vm372_vm4, %v811_v0 }
0x15d0   :  { %v1036_v3 = vld [vmem:[#allocation2] sm:$0xff] }
0x15d1   :  { %2246 = vmatprep.mubr.msk.f32.mxu1 %vm160_vm3, %v1036_v3 }
0x162e   :  { %v1200_v7 = vpop.f32.mrb[10].mxu0 }
0x162f   :  { %v2259_v8 = vpop.f32.mrb[11].mxu0 }
0x1639   :  { %v1033_v4 = vpop.permute.xlu0 %1032 }
0x163a   :  { %1035 = vst.msk [vmem:[#allocation2 + $0x8] sm:$0xc0] %vm596_vm5, %v1033_v4 }
0x1641   :  { %v1037_v5 = vld [vmem:[#allocation2 + $0x8] sm:$0xff] }
0x1642   :  { %2247 = vmatmul.mubr.msk.f32.vlgmr.msra.gmra.mrb[8].mxu1 %vm160_vm3, %v1037_v5 }
0x1643   :  { %2401 = vmatpush3.bf16.msra.mxu1 %v2879_v58  ;;  %2268 = vmatprep.mubr.msk.f32.mxu1 %vm2636_vm0, %v2637_v2 }
0x1644   :  { %2402 = vmatprep.subr.bf16.mxu1 %v2635_v1 }
0x1647   :  { %2404 = vmatpush3.bf16.msra.mxu1 %v2882_v10 }
0x1648   :  { %2411 = vmatprep.subr.bf16.mxu1 %v2635_v1 }
0x1715   :  { %v2248_v12 = vpop.f32.mrb[8].mxu1 }
0x1716   :  { %v2910_v13 = vadd.f32 %v2248_v12, %v2035_v9  ;;  %v1125_v15 = vpop.f32.mrb[9].mxu1 }
0x1717   :  { %v2912_v17 = vadd.f32 %v2035_v9, %v1125_v15 }
0x1719   :  { %v1204_v18 = vadd.f32 %v1200_v7, %v2912_v17 }
0x171b   :  { %2515 = vtanh.f32 %v1204_v18  ;;  %v2038_v20 = vmul.f32 -1.442695, %v1204_v18 }
0x171d   :  { %2517 = vpow2.f32 %v2038_v20 }
0x1725   :  { %v2516_v19 = vpop.eup %2515 }
0x1726   :  { %1214 = vrot.lane.b32.xlu1 %v2516_v19, %s2638_s2 }
0x1727   :  { %v2518_v21 = vpop.eup %2517 }
0x1728   :  { %v1208_v22 = vadd.f32 1.0, %v2518_v21 }
0x172a   :  { %2519 = vrcp.f32 %v1208_v22 }
0x1734   :  { %v2520_v23 = vpop.eup %2519 }
0x1735   :  { %v1212_v26 = vmul.f32 0.0, %v2520_v23 }
0x1798   :  { %v1215_v24 = vpop.permute.xlu1 %1214 }
0x1799   :  { %v1217_v25 = vmul.f32 %v2520_v23, %v1215_v24 }
0x179b   :  { %1219 = vrot.lane.b32.xlu0 %v1217_v25, %s2639_s3 }
0x180d   :  { %v1220_v27 = vpop.permute.xlu0 %1219 }
0x180e   :  { %v1222_v28 = vadd.f32 %v1220_v27, %v1212_v26 }
0x1810   :  { %2521 = vtanh.f32 %v1222_v28  ;;  %v1316_v44 = vrot.slane %v1222_v28, 6 }
0x181a   :  { %v2522_v29 = vpop.eup %2521 }
0x181b   :  { %1225 = vrot.lane.b32.xlu1 %v2522_v29, %s2638_s2 }
0x188d   :  { %v1226_v30 = vpop.permute.xlu1 %1225 }
0x188e   :  { %v1228_v16 = vmul.f32 %v2520_v23, %v1226_v30 }
0x1890   :  { %1230 = vrot.lane.b32.xlu0 %v1228_v16, %s2639_s3 }
0x1902   :  { %v1231_v31 = vpop.permute.xlu0 %1230 }
0x1903   :  { %2269 = vmatmul.mubr.msk.f32.vlgmr.msra.gmra.mrb[10].mxu1 %vm160_vm3, %v1231_v31 }
0x1904   :  { %2413 = vmatpush3.bf16.msra.mxu1 %v2879_v58  ;;  %2290 = vmatprep.mubr.msk.f32.mxu1 %vm2636_vm0, %v2637_v2 }
0x1905   :  { %2414 = vmatprep.subr.bf16.mxu1 %v2635_v1 }
0x1908   :  { %2416 = vmatpush3.bf16.msra.mxu1 %v2882_v10 }
0x1909   :  { %2423 = vmatprep.subr.bf16.mxu1 %v2635_v1 }
0x19d6   :  { %v1300_v33 = vpop.f32.mrb[10].mxu1 }
0x19d7   :  { %v1305_v34 = vrot.slane %v1300_v33, 6  ;;  %v2270_v35 = vpop.f32.mrb[11].mxu1 }
0x19d9   :  { %v1307_v36 = vadd.f32 %v1305_v34, %v2912_v17 }
0x19db   :  { %2523 = vtanh.f32 %v1307_v36  ;;  %v2040_v38 = vmul.f32 -1.442695, %v1307_v36 }
0x19dd   :  { %2525 = vpow2.f32 %v2040_v38 }
0x19e5   :  { %v2524_v37 = vpop.eup %2523 }
0x19e6   :  { %1320 = vrot.lane.b32.xlu1 %v2524_v37, %s2638_s2 }
0x19e7   :  { %v2526_v39 = vpop.eup %2525 }
0x19e8   :  { %v1311_v40 = vadd.f32 1.0, %v2526_v39 }
0x19ea   :  { %2527 = vrcp.f32 %v1311_v40 }
0x19f4   :  { %v2528_v41 = vpop.eup %2527 }
0x19f5   :  { %v1318_v45 = vmul.f32 %v2528_v41, %v1316_v44 }
0x1a58   :  { %v1321_v42 = vpop.permute.xlu1 %1320 }
0x1a59   :  { %v1323_v43 = vmul.f32 %v2528_v41, %v1321_v42 }
0x1a5b   :  { %1325 = vrot.lane.b32.xlu0 %v1323_v43, %s2639_s3 }
0x1acd   :  { %v1326_v14 = vpop.permute.xlu0 %1325 }
0x1ace   :  { %v1328_v46 = vadd.f32 %v1326_v14, %v1318_v45 }
0x1ad0   :  { %2529 = vtanh.f32 %v1328_v46  ;;  %v1423_v62 = vrot.slane %v1328_v46, 6 }
0x1ada   :  { %v2530_v47 = vpop.eup %2529 }
0x1adb   :  { %1331 = vrot.lane.b32.xlu1 %v2530_v47, %s2638_s2 }
0x1b4d   :  { %v1332_v48 = vpop.permute.xlu1 %1331 }
0x1b4e   :  { %v1334_v49 = vmul.f32 %v2528_v41, %v1332_v48 }
0x1b50   :  { %v1336_v50 = vrot.slane %v1334_v49, 2 }
0x1b52   :  { %1337 = vrot.lane.b32.xlu0 %v1336_v50, %s2639_s3 }
0x1bc4   :  { %v1338_v51 = vpop.permute.xlu0 %1337 }
0x1bc5   :  { %2280 = vmatmul.mubr.msk.f32.vlgmr.msra.gmra.mrb[12].mxu0 %vm160_vm3, %v1338_v51 }
0x1bc6   :  { %2419 = vmatpush3.bf16.msra.mxu0 %v2879_v58  ;;  %2301 = vmatprep.mubr.msk.f32.mxu0 %vm2636_vm0, %v2637_v2 }
0x1bc7   :  { %2420 = vmatprep.subr.bf16.mxu0 %v2635_v1 }
0x1bca   :  { %2422 = vmatpush3.bf16.msra.mxu0 %v2882_v10 }
0x1bcb   :  { %2429 = vmatprep.subr.bf16.mxu0 %v2635_v1 }
0x1c98   :  { %v1407_v52 = vpop.f32.mrb[12].mxu0 }
0x1c99   :  { %v1412_v32 = vrot.slane %v1407_v52, 4  ;;  %v2281_v53 = vpop.f32.mrb[13].mxu0 }
0x1c9b   :  { %v1414_v54 = vadd.f32 %v1412_v32, %v2912_v17 }
0x1c9d   :  { %2531 = vtanh.f32 %v1414_v54  ;;  %v2042_v56 = vmul.f32 -1.442695, %v1414_v54 }
0x1c9f   :  { %2533 = vpow2.f32 %v2042_v56 }
0x1ca7   :  { %v2532_v55 = vpop.eup %2531 }
0x1ca8   :  { %1427 = vrot.lane.b32.xlu1 %v2532_v55, %s2638_s2 }
0x1ca9   :  { %v2534_v57 = vpop.eup %2533 }
0x1caa   :  { %v1418_v59 = vadd.f32 1.0, %v2534_v57 }
0x1cac   :  { %2535 = vrcp.f32 %v1418_v59 }
0x1cb6   :  { %v2536_v6 = vpop.eup %2535 }
0x1cb7   :  { %v1425_v63 = vmul.f32 %v2536_v6, %v1423_v62 }
0x1d1a   :  { %v1428_v60 = vpop.permute.xlu1 %1427 }
0x1d1b   :  { %v1430_v61 = vmul.f32 %v2536_v6, %v1428_v60 }
0x1d1d   :  { %1432 = vrot.lane.b32.xlu0 %v1430_v61, %s2639_s3 }
0x1d8f   :  { %v1433_v11 = vpop.permute.xlu0 %1432 }
0x1d90   :  { %v1435_v0 = vadd.f32 %v1433_v11, %v1425_v63 }
0x1d92   :  { %2537 = vtanh.f32 %v1435_v0  ;;  %v1530_v26 = vrot.slane %v1435_v0, 6 }
0x1d9c   :  { %v2538_v3 = vpop.eup %2537 }
0x1d9d   :  { %1438 = vrot.lane.b32.xlu1 %v2538_v3, %s2638_s2 }
0x1e0f   :  { %v1439_v4 = vpop.permute.xlu1 %1438 }
0x1e10   :  { %v1441_v5 = vmul.f32 %v2536_v6, %v1439_v4 }
0x1e12   :  { %v1443_v7 = vrot.slane %v1441_v5, 4 }
0x1e14   :  { %1444 = vrot.lane.b32.xlu0 %v1443_v7, %s2639_s3 }
0x1e86   :  { %v1445_v8 = vpop.permute.xlu0 %1444 }
0x1e87   :  { %2291 = vmatmul.mubr.msk.f32.vlgmr.msra.gmra.mrb[12].mxu1 %vm160_vm3, %v1445_v8 }
0x1e88   :  { %2425 = vmatpush3.bf16.msra.mxu1 %v2879_v58  ;;  %2312 = vmatprep.mubr.msk.f32.mxu1 %vm2636_vm0, %v2637_v2 }
0x1e89   :  { %2426 = vmatprep.subr.bf16.mxu1 %v2635_v1 }
0x1e8c   :  { %2428 = vmatpush3.bf16.msra.mxu1 %v2882_v10 }
0x1e8d   :  { %2435 = vmatprep.subr.bf16.mxu1 %v2635_v1 }
0x1f5a   :  { %v1514_v9 = vpop.f32.mrb[12].mxu1 }
0x1f5b   :  { %v1519_v12 = vrot.slane %v1514_v9, 2  ;;  %v2292_v15 = vpop.f32.mrb[13].mxu1 }
0x1f5d   :  { %v1521_v18 = vadd.f32 %v1519_v12, %v2912_v17 }
0x1f5f   :  { %2539 = vtanh.f32 %v1521_v18  ;;  %v2044_v20 = vmul.f32 -1.442695, %v1521_v18 }
0x1f61   :  { %2541 = vpow2.f32 %v2044_v20 }
0x1f69   :  { %v2540_v19 = vpop.eup %2539 }
0x1f6a   :  { %1534 = vrot.lane.b32.xlu1 %v2540_v19, %s2638_s2 }
0x1f6b   :  { %v2542_v21 = vpop.eup %2541 }
0x1f6c   :  { %v1525_v22 = vadd.f32 1.0, %v2542_v21 }
0x1f6e   :  { %2543 = vrcp.f32 %v1525_v22 }
0x1f78   :  { %v2544_v23 = vpop.eup %2543 }
0x1f79   :  { %v1532_v27 = vmul.f32 %v2544_v23, %v1530_v26 }
0x1fdc   :  { %v1535_v24 = vpop.permute.xlu1 %1534 }
0x1fdd   :  { %v1537_v25 = vmul.f32 %v2544_v23, %v1535_v24 }
0x1fdf   :  { %1539 = vrot.lane.b32.xlu0 %v1537_v25, %s2639_s3 }
0x2051   :  { %v1540_v28 = vpop.permute.xlu0 %1539 }
0x2052   :  { %v1542_v29 = vadd.f32 %v1540_v28, %v1532_v27 }
0x2054   :  { %2545 = vtanh.f32 %v1542_v29  ;;  %v1634_v44 = vrot.slane %v1542_v29, 6 }
0x205e   :  { %v2546_v17 = vpop.eup %2545 }
0x205f   :  { %1545 = vrot.lane.b32.xlu1 %v2546_v17, %s2638_s2 }
0x20d1   :  { %v1546_v30 = vpop.permute.xlu1 %1545 }
0x20d2   :  { %v1548_v16 = vmul.f32 %v2544_v23, %v1546_v30 }
0x20d4   :  { %v1550_v31 = vrot.slane %v1548_v16, 6 }
0x20d6   :  { %1551 = vrot.lane.b32.xlu0 %v1550_v31, %s2639_s3 }
0x2148   :  { %v1552_v33 = vpop.permute.xlu0 %1551 }
0x2149   :  { %2302 = vmatmul.mubr.msk.f32.vlgmr.msra.gmra.mrb[14].mxu0 %vm160_vm3, %v1552_v33 }
0x214a   :  { %2431 = vmatpush3.bf16.msra.mxu0 %v2879_v58  ;;  %2323 = vmatprep.mubr.msk.f32.mxu0 %vm2636_vm0, %v2637_v2 }
0x214b   :  { %2432 = vmatprep.subr.bf16.mxu0 %v2635_v1 }
0x214e   :  { %2434 = vmatpush3.bf16.msra.mxu0 %v2882_v10 }
0x221c   :  { %v1621_v34 = vpop.f32.mrb[14].mxu0 }
0x221d   :  { %v1625_v35 = vadd.f32 %v1621_v34, %v2910_v13  ;;  %v2303_v36 = vpop.f32.mrb[15].mxu0 }
0x221f   :  { %2547 = vtanh.f32 %v1625_v35  ;;  %v2046_v38 = vmul.f32 -1.442695, %v1625_v35 }
0x2221   :  { %2549 = vpow2.f32 %v2046_v38 }
0x2229   :  { %v2548_v37 = vpop.eup %2547 }
0x222a   :  { %1638 = vrot.lane.b32.xlu1 %v2548_v37, %s2638_s2 }
0x222b   :  { %v2550_v39 = vpop.eup %2549 }
0x222c   :  { %v1629_v40 = vadd.f32 1.0, %v2550_v39 }
0x222e   :  { %2551 = vrcp.f32 %v1629_v40  ;;  %v2053_v40 = vld [vmem:[%s3006_s7] ss:$0 sm:$0xff] }
0x2238   :  { %v2552_v41 = vpop.eup %2551 }
0x2239   :  { %v1636_v45 = vmul.f32 %v2552_v41, %v1634_v44 }
0x229c   :  { %v1639_v42 = vpop.permute.xlu1 %1638 }
0x229d   :  { %v1641_v43 = vmul.f32 %v2552_v41, %v1639_v42 }
0x229f   :  { %1643 = vrot.lane.b32.xlu0 %v1641_v43, %s2639_s3 }
0x2311   :  { %v1644_v14 = vpop.permute.xlu0 %1643 }
0x2312   :  { %v1646_v46 = vadd.f32 %v1644_v14, %v1636_v45 }
0x2314   :  { %2553 = vtanh.f32 %v1646_v46 }
0x231e   :  { %v2554_v47 = vpop.eup %2553 }
0x231f   :  { %1649 = vrot.lane.b32.xlu1 %v2554_v47, %s2638_s2 }
0x2391   :  { %v1650_v48 = vpop.permute.xlu1 %1649 }
0x2392   :  { %v1652_v49 = vmul.f32 %v2552_v41, %v1650_v48 }
0x2394   :  { %1654 = vrot.lane.b32.xlu0 %v1652_v49, %s2639_s3 }
0x2406   :  { %v1655_v50 = vpop.permute.xlu0 %1654 }
0x2407   :  { %2313 = vmatmul.mubr.msk.f32.vlgmr.msra.gmra.mrb[14].mxu1 %vm160_vm3, %v1655_v50  ;;  %v2054_v50 = vld [vmem:[#allocation3] ss:$0 sm:$0xff] }
0x2408   :  { %2437 = vmatpush3.bf16.msra.mxu1 %v2879_v58  ;;  %2334 = vmatprep.mubr.msk.f32.mxu1 %vm2636_vm0, %v2637_v2 }
0x2409   :  { %2438 = vmatprep.subr.bf16.mxu1 %v2635_v1  ;;  %v1740_v1 = vrot.slane %v1646_v46, 6 }
0x240c   :  { %2440 = vmatpush3.bf16.msra.mxu1 %v2882_v10 }
0x24da   :  { %v1724_v51 = vpop.f32.mrb[14].mxu1 }
0x24db   :  { %v1729_v52 = vrot.slane %v1724_v51, 6  ;;  %v2314_v32 = vpop.f32.mrb[15].mxu1 }
0x24dd   :  { %v1731_v53 = vadd.f32 %v1729_v52, %v2910_v13 }
0x24df   :  { %2555 = vtanh.f32 %v1731_v53  ;;  %v2048_v55 = vmul.f32 -1.442695, %v1731_v53 }
0x24e1   :  { %2557 = vpow2.f32 %v2048_v55 }
0x24e9   :  { %v2556_v54 = vpop.eup %2555 }
0x24ea   :  { %1744 = vrot.lane.b32.xlu1 %v2556_v54, %s2638_s2 }
0x24eb   :  { %v2558_v56 = vpop.eup %2557 }
0x24ec   :  { %v1735_v58 = vadd.f32 1.0, %v2558_v56 }
0x24ee   :  { %2559 = vrcp.f32 %v1735_v58 }
0x24f8   :  { %v2560_v57 = vpop.eup %2559 }
0x24f9   :  { %v1742_v10 = vmul.f32 %v2560_v57, %v1740_v1 }
0x255c   :  { %v1745_v2 = vpop.permute.xlu1 %1744 }
0x255d   :  { %v1747_v59 = vmul.f32 %v2560_v57, %v1745_v2 }
0x255f   :  { %1749 = vrot.lane.b32.xlu0 %v1747_v59, %s2639_s3 }
0x25d1   :  { %v1750_v6 = vpop.permute.xlu0 %1749 }
0x25d2   :  { %v1752_v60 = vadd.f32 %v1750_v6, %v1742_v10 }
0x25d4   :  { %2561 = vtanh.f32 %v1752_v60  ;;  %v1847_v21 = vrot.slane %v1752_v60, 6 }
0x25de   :  { %v2562_v61 = vpop.eup %2561 }
0x25df   :  { %1755 = vrot.lane.b32.xlu1 %v2562_v61, %s2638_s2 }
0x2651   :  { %v1756_v62 = vpop.permute.xlu1 %1755 }
0x2652   :  { %v1758_v63 = vmul.f32 %v2560_v57, %v1756_v62 }
0x2654   :  { %v1760_v11 = vrot.slane %v1758_v63, 2 }
0x2656   :  { %1761 = vrot.lane.b32.xlu0 %v1760_v11, %s2639_s3 }
0x26c8   :  { %v1762_v0 = vpop.permute.xlu0 %1761 }
0x26c9   :  { %2324 = vmatmul.mubr.msk.f32.vlgmr.msra.gmra.mrb[16].mxu0 %vm160_vm3, %v1762_v0 }
0x279c   :  { %v1831_v3 = vpop.f32.mrb[16].mxu0 }
0x279d   :  { %v1836_v4 = vrot.slane %v1831_v3, 4  ;;  %v2325_v5 = vpop.f32.mrb[17].mxu0 }
0x279f   :  { %v1838_v7 = vadd.f32 %v1836_v4, %v2910_v13 }
0x27a1   :  { %2563 = vtanh.f32 %v1838_v7  ;;  %v2050_v9 = vmul.f32 -1.442695, %v1838_v7 }
0x27a3   :  { %2565 = vpow2.f32 %v2050_v9 }
0x27ab   :  { %v2564_v8 = vpop.eup %2563 }
0x27ac   :  { %1851 = vrot.lane.b32.xlu1 %v2564_v8, %s2638_s2 }
0x27ad   :  { %v2566_v12 = vpop.eup %2565 }
0x27ae   :  { %v1842_v15 = vadd.f32 1.0, %v2566_v12 }
0x27b0   :  { %2567 = vrcp.f32 %v1842_v15 }
0x27ba   :  { %v2568_v18 = vpop.eup %2567 }
0x27bb   :  { %v1849_v22 = vmul.f32 %v2568_v18, %v1847_v21 }
0x281e   :  { %v1852_v19 = vpop.permute.xlu1 %1851 }
0x281f   :  { %v1854_v20 = vmul.f32 %v2568_v18, %v1852_v19 }
0x2821   :  { %1856 = vrot.lane.b32.xlu0 %v1854_v20, %s2639_s3 }
0x2893   :  { %v1857_v23 = vpop.permute.xlu0 %1856 }
0x2894   :  { %v1859_v24 = vadd.f32 %v1857_v23, %v1849_v22 }
0x2896   :  { %2569 = vtanh.f32 %v1859_v24 }
0x28a0   :  { %v2570_v25 = vpop.eup %2569 }
0x28a1   :  { %1862 = vrot.lane.b32.xlu1 %v2570_v25, %s2638_s2 }
0x2913   :  { %v1863_v26 = vpop.permute.xlu1 %1862 }
0x2914   :  { %v1865_v27 = vmul.f32 %v2568_v18, %v1863_v26 }
0x2916   :  { %v1867_v28 = vrot.slane %v1865_v27, 4 }
0x2918   :  { %1868 = vrot.lane.b32.xlu0 %v1867_v28, %s2639_s3 }
0x298a   :  { %v1869_v29 = vpop.permute.xlu0 %1868 }
0x298b   :  { %2335 = vmatmul.mubr.msk.f32.vlgmr.msra.gmra.mrb[16].mxu1 %vm160_vm3, %v1869_v29 }
0x2a5e   :  { %v1938_v17 = vpop.f32.mrb[16].mxu1 }
0x2a5f   :  { %v1943_v30 = vrot.slane %v1938_v17, 2  ;;  %v2336_v16 = vpop.f32.mrb[17].mxu1 }
0x2a61   :  { %v1945_v31 = vadd.f32 %v1943_v30, %v2910_v13  ;;  %v1954_v13 = vrot.slane %v1859_v24, 6 }
0x2a63   :  { %2571 = vtanh.f32 %v1945_v31  ;;  %v2052_v34 = vmul.f32 -1.442695, %v1945_v31 }
0x2a65   :  { %2573 = vpow2.f32 %v2052_v34 }
0x2a6d   :  { %v2572_v33 = vpop.eup %2571 }
0x2a6e   :  { %1958 = vrot.lane.b32.xlu1 %v2572_v33, %s2638_s2 }
0x2a6f   :  { %v2574_v35 = vpop.eup %2573 }
0x2a70   :  { %v1949_v36 = vadd.f32 1.0, %v2574_v35 }
0x2a72   :  { %2575 = vrcp.f32 %v1949_v36 }
0x2a7c   :  { %v2576_v37 = vpop.eup %2575 }
0x2a7d   :  { %v1956_v41 = vmul.f32 %v2576_v37, %v1954_v13 }
0x2ae0   :  { %v1959_v38 = vpop.permute.xlu1 %1958 }
0x2ae1   :  { %v1961_v39 = vmul.f32 %v2576_v37, %v1959_v38 }
0x2ae3   :  { %1963 = vrot.lane.b32.xlu0 %v1961_v39, %s2639_s3 }
0x2ae7   :  { %1979 = vrot.lane.b32.xlu0 %v2053_v40, %s2640_s14 }
0x2b55   :  { %v1964_v42 = vpop.permute.xlu0 %1963 }
0x2b56   :  { %v1966_v43 = vadd.f32 %v1964_v42, %v1956_v41 }
0x2b58   :  { %2577 = vtanh.f32 %v1966_v43 }
0x2b59   :  { %v1980_v14 = vpop.permute.xlu0 %1979 }
0x2b62   :  { %v2578_v44 = vpop.eup %2577 }
0x2b63   :  { %1969 = vrot.lane.b32.xlu1 %v2578_v44, %s2638_s2 }
0x2bd5   :  { %v1970_v45 = vpop.permute.xlu1 %1969 }
0x2bd6   :  { %v1972_v46 = vmul.f32 %v2576_v37, %v1970_v45 }
0x2bd8   :  { %v1982_v47 = vmul.f32 %v1980_v14, %v1972_v46 }
0x2bda   :  { %1984 = vrot.lane.b32.xlu1 %v1982_v47, %s2639_s3 }
0x2c4c   :  { %v1985_v48 = vpop.permute.xlu1 %1984 }
0x2c4d   :  { %v1987_v49 = vsel %vm596_vm5, %v1985_v48, 0.0 }
0x2c4e   :  { %1988 = vadd.xlane.f32.xlu0 %v1987_v49 }
0x2cdb   :  { %v1989_v51 = vpop.xlane.xlu0 %1988 }
0x2cdc   :  { %v1997_v52 = vadd.f32 %v2054_v50, %v1989_v51 }
0x2cde   :  { %1999 = vst.msk [vmem:[%s3009_s10 - $0x6] sm:$0xc0] %vm1998_vm7, %v1997_v52  ;;  %v2055_v32 = vmul.f32 -1.442695, %v1997_v52 }
0x2ce0   :  { %2579 = vpow2.f32 %v2055_v32 }
0x2cea   :  { %v2580_v53 = vpop.eup %2579 }
0x2ceb   :  { %v2003_v54 = vadd.f32 1.0, %v2580_v53 }
0x2ced   :  { %2581 = vrcp.f32 %v2003_v54 }
0x2cf7   :  { %v2582_v55 = vpop.eup %2581 }
0x2cf8   :  { %2006 = vst.msk [vmem:[%s3008_s9 - $0x6] sm:$0xc0] %vm1998_vm7, %v2582_v55 }
0x2cf9   :  { %2015 = vsyncpa [#allocation5], 1 }
0x2cfa   :  { %2016 = vsyncpa [#allocation7], 1 }

</bundles_post_ra>
